<compile_context>
chip_gen: v5e
topology: v5e:2x2
jax: 0.10.0
libtpu: 0.0.40
codegen_flags: <defaults>
</compile_context>

<pallas_src>
import math
import functools

import jax
import jax.numpy as jnp
from jax import lax
from jax.experimental import pallas as pl
from jax.experimental.pallas import tpu as pltpu


# --------------------------- hardware-adaptive knobs ------------------------ #

def _vmem_capacity_bytes():
    """Physical VMEM per TensorCore; conservative fallback if the query fails."""
    try:
        return int(pltpu.get_tpu_info().vmem_capacity_bytes)
    except Exception:
        return 64 * 1024 * 1024          # v7x per-TC size == worst case


_VMEM_CAP = _vmem_capacity_bytes()
_BIG_VMEM = _VMEM_CAP >= 100 * 1024 * 1024          # v5e / v6e (128 MiB)
# Scoped-VMEM limit: generous on v5e/v6e, <= 48 MiB on v7x (64 MiB physical).
_VMEM_LIMIT = int(min(_VMEM_CAP * 3 // 4, 96 * 1024 * 1024))

# Tile targets (actual blocks shrink to the full extent for smaller arrays).
_GEMM_TM = 512
_GEMM_TN = 1024 if _BIG_VMEM else 512
_GEMM_TK = 1024 if _BIG_VMEM else 512
_ATTN_TQ = 1024 if _BIG_VMEM else 512    # K/V HBM re-streaming ~ Sq / bq
_ATTN_TK = 512


# ------------------------------- tiling utils ------------------------------- #

def _tile(dim, target, align):
    """Largest aligned divisor of `dim` <= target (the full dim is always legal)."""
    if dim <= target:
        return dim
    for t in range(target, 0, -1):
        if dim % t == 0 and t % align == 0:
            return t
    return dim


def _block_and_pad(dim, target, align):
    """Return (block, padded_dim): block divides padded_dim and is `align`-aligned
    (or is the full extent).  Pads only when no aligned divisor <= target exists,
    so nice sizes never pay for padding."""
    if dim <= target:
        return dim, dim
    if dim % target == 0:
        return target, dim
    for t in range(target, 0, -1):
        if dim % t == 0 and t % align == 0:
            return t, dim
    padded = ((dim + target - 1) // target) * target
    return target, padded


# --------------------------- tiled linear (GEMM) ---------------------------- #

def _linear_kernel(x_ref, w_ref, b_ref, o_ref, acc_ref, *, mxu_dtype):
    """One (bm, bn) output tile; accumulates over the K grid axis in f32 scratch.
    Operands are cast to `mxu_dtype` (bf16 by default) right before the MXU."""
    k = pl.program_id(2)

    @pl.when(k == 0)
    def _init():
        acc_ref[...] = jnp.zeros(acc_ref.shape, acc_ref.dtype)

    acc_ref[...] += jnp.dot(x_ref[...].astype(mxu_dtype),
                            w_ref[...].astype(mxu_dtype),
                            preferred_element_type=jnp.float32)

    @pl.when(k == pl.num_programs(2) - 1)
    def _finalize():
        o_ref[...] = (acc_ref[...] + b_ref[...].astype(jnp.float32)).astype(o_ref.dtype)


def linear(x, w, b, *, mxu_bf16=True, tm=None, tn=None, tk=None):
    """y = x @ w + b with a pipelined (M, N, K) grid. x:(M,K), w:(K,N), b:(N,)."""
    M, K = x.shape
    N = w.shape[1]
    tm = tm or _GEMM_TM
    tn = tn or _GEMM_TN
    tk = tk or _GEMM_TK
    # The row (batch*seq) axis is padded to a tile-aligned size when awkward;
    # K/N are model widths (essentially always 128-aligned) -> full-extent fallback.
    bm, M_pad = _block_and_pad(M, tm, 8)
    if M_pad != M:
        x = jnp.pad(x, ((0, M_pad - M), (0, 0)))
    bn = _tile(N, tn, 128)
    bk = _tile(K, tk, 128)
    mxu_dtype = jnp.bfloat16 if mxu_bf16 else x.dtype

    out = pl.pallas_call(
        functools.partial(_linear_kernel, mxu_dtype=mxu_dtype),
        out_shape=jax.ShapeDtypeStruct((M_pad, N), x.dtype),
        grid=(M_pad // bm, N // bn, K // bk),
        in_specs=[
            pl.BlockSpec((bm, bk), lambda i, j, k: (i, k)),
            pl.BlockSpec((bk, bn), lambda i, j, k: (k, j)),
            pl.BlockSpec((1, bn), lambda i, j, k: (0, j)),
        ],
        out_specs=pl.BlockSpec((bm, bn), lambda i, j, k: (i, j)),
        scratch_shapes=[pltpu.VMEM((bm, bn), jnp.float32)],
        compiler_params=pltpu.CompilerParams(
            dimension_semantics=("parallel", "parallel", "arbitrary"),
            vmem_limit_bytes=_VMEM_LIMIT),
    )(x, w, b.reshape(1, N))
    return out if M_pad == M else out[:M]


# ------------------------ flash-style attention kernel ---------------------- #

def _flash_mha_kernel(q_ref, k_ref, v_ref, mask_ref, o_ref,
                      m_sc, l_sc, acc_sc, *, n_heads, d_k, mxu_dtype, unroll):
    # Lane-dense blocks: q_ref (1, bq, D), k_ref/v_ref (1, bk, D), D = H*d_k.
    # mask_ref: (1, 1, bk) or (1, bq, bk); o_ref: (1, bq, D).
    # Scratch (f32): m_sc/l_sc (bq, H) running max / denominator,
    #                acc_sc (bq, D) running numerator (head h at lanes h*d_k..).
    ki = pl.program_id(2)

    @pl.when(ki == 0)
    def _init():
        m_sc[...] = jnp.full(m_sc.shape, -jnp.inf, m_sc.dtype)
        l_sc[...] = jnp.zeros(l_sc.shape, l_sc.dtype)
        acc_sc[...] = jnp.zeros(acc_sc.shape, acc_sc.dtype)

    # Compact mask row, hoisted out of the head loop; 0 => masked (score -> -1e9),
    # matching torch.masked_fill.  Broadcasts over query rows (and heads).
    keep = mask_ref[0] != 0

    def one_head(dsl, hsl):
        # dsl: lane slice selecting this head's d_k columns;
        # hsl: this head's column in the (bq, H) running-stat scratch.
        # 1/sqrt(d_k) is pre-folded into W_q, so no per-head scale multiply here.
        qh = q_ref[0, :, dsl].astype(mxu_dtype)                       # (bq, dk)
        kh = k_ref[0, :, dsl].astype(mxu_dtype)                       # (bk, dk)
        vh = v_ref[0, :, dsl].astype(mxu_dtype)                       # (bk, dk)

        # QK^T without materializing a transpose: contract the last axes.
        s = lax.dot_general(qh, kh, (((1,), (1,)), ((), ())),
                            preferred_element_type=jnp.float32)       # (bq, bk)
        s = jnp.where(keep, s, -1e9)

        # Online softmax update (flash attention), all state in f32.
        m_prev = m_sc[:, hsl]                                          # (bq, 1)
        m_new = jnp.maximum(m_prev, jnp.max(s, axis=-1, keepdims=True))
        alpha = jnp.exp(m_prev - m_new)
        p = jnp.exp(s - m_new)                                         # f32 probs
        l_sc[:, hsl] = alpha * l_sc[:, hsl] + jnp.sum(p, axis=-1, keepdims=True)
        pv = lax.dot_general(p.astype(mxu_dtype), vh,
                             (((1,), (0,)), ((), ())),
                             preferred_element_type=jnp.float32)       # (bq, dk)
        acc_sc[:, dsl] = alpha * acc_sc[:, dsl] + pv
        m_sc[:, hsl] = m_new

    if unroll:
        # Small head counts: static unroll (cheap, LLO-schedulable).
        for h in range(n_heads):
            one_head(slice(h * d_k, (h + 1) * d_k), slice(h, h + 1))
    else:
        # Large head counts: real loop bounds live ranges / instruction stream.
        def _head_body(h, carry):
            lo = pl.multiple_of(h * d_k, d_k)
            one_head(pl.ds(lo, d_k), pl.ds(h, 1))
            return carry
        lax.fori_loop(0, n_heads, _head_body, 0)

    @pl.when(ki == pl.num_programs(2) - 1)
    def _finalize():
        if unroll:
            l = l_sc[...]                                  # (bq, H)
            inv_l = pl.reciprocal(l, approx=True)          # EUP slot, ~free
            inv_l = inv_l * (2.0 - l * inv_l)              # one Newton step
            outs = [acc_sc[:, h * d_k:(h + 1) * d_k] * inv_l[:, h:h + 1]
                    for h in range(n_heads)]
            # Single lane-dense store: last dim = H*d_k = d_model.
            o_ref[0] = jnp.concatenate(outs, axis=-1).astype(o_ref.dtype)
        else:
            def _fin_body(h, carry):
                lo = pl.multiple_of(h * d_k, d_k)
                l_h = l_sc[:, pl.ds(h, 1)]
                inv = pl.reciprocal(l_h, approx=True)
                inv = inv * (2.0 - l_h * inv)
                o_ref[0, :, pl.ds(lo, d_k)] = (
                    acc_sc[:, pl.ds(lo, d_k)] * inv).astype(o_ref.dtype)
                return carry
            lax.fori_loop(0, n_heads, _fin_body, 0)


def _flash_call(q, k, v, mask, *, n_heads, d_model, bq, bk,
                q_col, k_col, v_col, mxu_bf16):
    """Shared pallas_call builder.  q/k/v may be the same (B,S,3D) buffer in the
    fused-QKV case; *_col selects the d_model-wide column group via the index_map."""
    B, Sq_p = q.shape[0], q.shape[1]
    Sk_p = k.shape[1]
    d_k = d_model // n_heads

    # v7x has 2 TensorCores: make sure the parallel grid axes expose >= 2 steps.
    if B * (Sq_p // bq) < 2 and bq % 16 == 0:
        bq //= 2

    grid = (B, Sq_p // bq, Sk_p // bk)
    mxu_dtype = jnp.bfloat16 if mxu_bf16 else q.dtype
    kernel = functools.partial(_flash_mha_kernel, n_heads=n_heads, d_k=d_k,
                               mxu_dtype=mxu_dtype, unroll=n_heads <= 8)

    if mask.shape[1] == 1:          # compact key-padding mask (B, 1, Sk)
        mask_spec = pl.BlockSpec((1, 1, bk), lambda b, qi, ki: (b, 0, ki))
    else:                            # genuine per-query mask (B, Sq, Sk)
        mask_spec = pl.BlockSpec((1, bq, bk), lambda b, qi, ki: (b, qi, ki))

    return pl.pallas_call(
        kernel,
        out_shape=jax.ShapeDtypeStruct((B, Sq_p, d_model), q.dtype),
        grid=grid,
        in_specs=[
            pl.BlockSpec((1, bq, d_model), lambda b, qi, ki: (b, qi, q_col)),
            pl.BlockSpec((1, bk, d_model), lambda b, qi, ki: (b, ki, k_col)),
            pl.BlockSpec((1, bk, d_model), lambda b, qi, ki: (b, ki, v_col)),
            mask_spec,
        ],
        out_specs=pl.BlockSpec((1, bq, d_model), lambda b, qi, ki: (b, qi, 0)),
        scratch_shapes=[
            pltpu.VMEM((bq, n_heads), jnp.float32),   # running max  (per head)
            pltpu.VMEM((bq, n_heads), jnp.float32),   # running denominator
            pltpu.VMEM((bq, d_model), jnp.float32),   # running numerator (lane-dense)
        ],
        compiler_params=pltpu.CompilerParams(
            dimension_semantics=("parallel", "parallel", "arbitrary"),
            vmem_limit_bytes=_VMEM_LIMIT),
    )(q, k, v, mask)


def flash_mha(q, k, v, mask, *, n_heads, mxu_bf16=True, tq=None, tk=None):
    """q:(B,Sq,D), k/v:(B,Sk,D) lane-dense (heads packed along the last dim),
    mask:(B,1,Sk) or (B,Sq,Sk) int.  Returns the merged-head context (B,Sq,D)."""
    B, Sq, D = q.shape
    Sk = k.shape[1]
    tq = tq or _ATTN_TQ
    tk = tk or _ATTN_TK

    bq, Sq_p = _block_and_pad(Sq, tq, 8)
    bk, Sk_p = _block_and_pad(Sk, tk, 128)

    if Sq_p != Sq:                   # padded query rows are sliced off at the end
        q = jnp.pad(q, ((0, 0), (0, Sq_p - Sq), (0, 0)))
        if mask.shape[1] != 1:
            mask = jnp.pad(mask, ((0, 0), (0, Sq_p - Sq), (0, 0)), constant_values=1)
    if Sk_p != Sk:                   # padded keys are masked out (mask padded with 0)
        k = jnp.pad(k, ((0, 0), (0, Sk_p - Sk), (0, 0)))
        v = jnp.pad(v, ((0, 0), (0, Sk_p - Sk), (0, 0)))
        mask = jnp.pad(mask, ((0, 0), (0, 0), (0, Sk_p - Sk)))

    out = _flash_call(q, k, v, mask, n_heads=n_heads, d_model=D,
                      bq=bq, bk=bk, q_col=0, k_col=0, v_col=0, mxu_bf16=mxu_bf16)
    return out if Sq_p == Sq else out[:, :Sq]


def flash_mha_fused(qkv, mask, *, n_heads, d_model, mxu_bf16=True, tq=None, tk=None):
    """Self-attention from a fused QKV activation (B, S, 3*d_model) laid out as
    [q | k | v] along the last axis.  In the fast path q/k/v are never
    materialized in HBM: the same buffer is passed three times and each
    BlockSpec index_map selects its column group (block index 0/1/2)."""
    B, S, _ = qkv.shape
    tq = tq or _ATTN_TQ
    tk = tk or _ATTN_TK
    bq, Sq_p = _block_and_pad(S, tq, 8)
    bk, Sk_p = _block_and_pad(S, tk, 128)

    if d_model % 128 != 0 or Sq_p != S or Sk_p != S:
        # Lane-misaligned d_model or awkward sequence length: fall back to the
        # general path (materializes the three slices once).
        q = qkv[..., :d_model]
        k = qkv[..., d_model:2 * d_model]
        v = qkv[..., 2 * d_model:]
        return flash_mha(q, k, v, mask, n_heads=n_heads,
                         mxu_bf16=mxu_bf16, tq=tq, tk=tk)

    return _flash_call(qkv, qkv, qkv, mask, n_heads=n_heads, d_model=d_model,
                       bq=bq, bk=bk, q_col=0, k_col=1, v_col=2, mxu_bf16=mxu_bf16)


# ------------------------------ module wrapper ------------------------------ #

class MultiHeadedAttentionPallas:
    """Pallas TPU re-implementation of the PyTorch MultiHeadedAttention forward."""

    def __init__(self, h, d_model, key, dtype=jnp.float32, mxu_bf16=True):
        assert d_model % h == 0
        self.h = h
        self.d_k = d_model // h
        self.d_model = d_model
        self.dtype = dtype
        # Feed the MXU bf16 operands even for f32 models (accumulation stays f32).
        self.mxu_bf16 = mxu_bf16

        # 4x Linear(d_model, d_model); PyTorch-style U(-1/sqrt(fan_in), +bound) init.
        # Weights stored (Din, Dout), i.e. pre-transposed for y = x @ W + b.
        bound = 1.0 / math.sqrt(d_model)
        keys = jax.random.split(key, 8)
        self.weights, self.biases = [], []
        for i in range(4):
            w = jax.random.uniform(keys[2 * i], (d_model, d_model),
                                   jnp.float32, -bound, bound)
            b = jax.random.uniform(keys[2 * i + 1], (d_model,),
                                   jnp.float32, -bound, bound)
            self.weights.append(w.astype(dtype))
            self.biases.append(b.astype(dtype))

        # Fold 1/sqrt(d_k) into the query projection at init time (zero runtime
        # cost); self.weights stay un-scaled so the reference matches PyTorch math.
        scale = 1.0 / math.sqrt(self.d_k)
        wq = (self.weights[0].astype(jnp.float32) * scale).astype(dtype)
        bq = (self.biases[0].astype(jnp.float32) * scale).astype(dtype)
        self.kernel_weights = [wq, self.weights[1], self.weights[2], self.weights[3]]
        self.kernel_biases = [bq, self.biases[1], self.biases[2], self.biases[3]]

        # Fused (D, 3D) QKV weight for the self-attention fast path (one GEMM).
        self.w_qkv = jnp.concatenate(self.kernel_weights[:3], axis=1)   # (D, 3D)
        self.b_qkv = jnp.concatenate(self.kernel_biases[:3])            # (3D,)

    def __call__(self, query, key, value, mask=None):
        B, Sq, D = query.shape
        Sk = key.shape[1]
        dt = self.dtype

        # Compact int32 mask; (B,1,Sk) padding masks stay compact and are
        # broadcast over heads and query rows inside the kernel.
        if mask is None:
            mask_arr = jnp.ones((B, 1, Sk), jnp.int32)
        else:
            mask_arr = jnp.asarray(mask)
            if mask_arr.ndim == 4:            # PyTorch-style (B, 1, [1|Sq], Sk)
                mask_arr = mask_arr[:, 0]
            elif mask_arr.ndim == 2:          # (B, Sk)
                mask_arr = mask_arr[:, None, :]
            mask_arr = mask_arr.astype(jnp.int32)

        if (query is key) and (key is value):
            # One fused QKV GEMM; q/k/v stay packed in the (B, S, 3D) buffer and
            # are selected by the attention kernel's BlockSpec index_maps.
            qkv = linear(query.astype(dt).reshape(B * Sq, D),
                         self.w_qkv, self.b_qkv,
                         mxu_bf16=self.mxu_bf16).reshape(B, Sq, 3 * D)
            ctx = flash_mha_fused(qkv, mask_arr, n_heads=self.h, d_model=D,
                                  mxu_bf16=self.mxu_bf16)
        else:
            q = linear(query.astype(dt).reshape(B * Sq, D),
                       self.kernel_weights[0], self.kernel_biases[0],
                       mxu_bf16=self.mxu_bf16).reshape(B, Sq, D)
            k = linear(key.astype(dt).reshape(B * Sk, D),
                       self.kernel_weights[1], self.kernel_biases[1],
                       mxu_bf16=self.mxu_bf16).reshape(B, Sk, D)
            v = linear(value.astype(dt).reshape(B * Sk, D),
                       self.kernel_weights[2], self.kernel_biases[2],
                       mxu_bf16=self.mxu_bf16).reshape(B, Sk, D)
            ctx = flash_mha(q, k, v, mask_arr, n_heads=self.h,
                            mxu_bf16=self.mxu_bf16)

        # TODO(synk): dropout(p=0.1) on the attention probs is identity (eval mode).
        out = linear(ctx.reshape(B * Sq, D), self.kernel_weights[3],
                     self.kernel_biases[3], mxu_bf16=self.mxu_bf16)
        return out.reshape(B, Sq, D)


# ---------------------------- pure-JAX reference ----------------------------- #

def _reference(mha, query, key, value, mask):
    f32 = jnp.float32
    B, Sq, D = query.shape
    Sk = key.shape[1]
    H, dk = mha.h, mha.d_k
    W = [w.astype(f32) for w in mha.weights]
    Bs = [b.astype(f32) for b in mha.biases]

    def proj(x, i, S):
        y = x.astype(mha.dtype).astype(f32).reshape(B * S, D) @ W[i] + Bs[i]
        return y.reshape(B, S, H, dk)

    q, k, v = proj(query, 0, Sq), proj(key, 1, Sk), proj(value, 2, Sk)
    scores = jnp.einsum('bqhd,bkhd->bhqk', q, k) / math.sqrt(dk)
    if mask is not None:
        m = jnp.asarray(mask)
        if m.ndim == 2:
            m = m[:, None, :]
        if m.ndim == 3:
            m = m[:, None]                    # broadcast over heads
        scores = jnp.where(m == 0, -1e9, scores)
    p = jax.nn.softmax(scores, axis=-1)
    ctx = jnp.einsum('bhqk,bkhd->bqhd', p, v).reshape(B * Sq, D)
    return (ctx @ W[3] + Bs[3]).reshape(B, Sq, D)


# ---------------------------------- main ------------------------------------ #

if __name__ == "__main__":
    B, S, d_model, h = 2, 8, 128, 4

    root = jax.random.PRNGKey(0)
    k_param, k_q, k_k, k_v, k_m = jax.random.split(root, 5)

    query = jax.random.normal(k_q, (B, S, d_model), jnp.float32)
    key_ = jax.random.normal(k_k, (B, S, d_model), jnp.float32)
    value = jax.random.normal(k_v, (B, S, d_model), jnp.float32)
    # padding mask: (B, 1, S), 1 = attend, 0 = masked
    mask = (jax.random.uniform(k_m, (B, 1, S)) > 0.2).astype(jnp.int32)

    # --- exact-f32 instance (MXU fed f32): tight structural check ------------- #
    mha_exact = MultiHeadedAttentionPallas(h, d_model, k_param, mxu_bf16=False)
    fwd_exact = jax.jit(lambda q, k, v, m: mha_exact(q, k, v, mask=m))
    out = jax.block_until_ready(fwd_exact(query, key_, value, mask))
    ref = _reference(mha_exact, query, key_, value, mask)
    assert out.shape == (B, S, d_model)
    assert jnp.allclose(out, ref, rtol=1e-2, atol=1e-2), "mismatch (f32 exact, cross)"

    # --- default instance: bf16 MXU feeds, f32 accumulation -------------------- #
    mha = MultiHeadedAttentionPallas(h, d_model, k_param)        # mxu_bf16=True
    fwd_cross = jax.jit(lambda q, k, v, m: mha(q, k, v, mask=m))
    fwd_self = jax.jit(lambda x, m: mha(x, x, x, mask=m))        # fused-QKV path
    fwd_nomask = jax.jit(lambda q, k, v: mha(q, k, v))

    out_c = jax.block_until_ready(fwd_cross(query, key_, value, mask))
    assert jnp.allclose(out_c, ref, rtol=6e-2, atol=6e-2), "mismatch (bf16-MXU, cross)"

    out_s = jax.block_until_ready(fwd_self(query, mask))
    ref_s = _reference(mha, query, query, query, mask)
    assert jnp.allclose(out_s, ref_s, rtol=6e-2, atol=6e-2), "mismatch (fused QKV)"

    out_n = jax.block_until_ready(fwd_nomask(query, key_, value))
    ref_n = _reference(mha, query, key_, value, None)
    assert jnp.allclose(out_n, ref_n, rtol=6e-2, atol=6e-2), "mismatch (no mask)"

    # --- bf16 parameters / activations ------------------------------------------ #
    mha_bf16 = MultiHeadedAttentionPallas(h, d_model, k_param, dtype=jnp.bfloat16)
    fwd_bf16 = jax.jit(lambda q, k, v, m: mha_bf16(q, k, v, mask=m))
    out_b = jax.block_until_ready(fwd_bf16(query, key_, value, mask))
    ref_b = _reference(mha_bf16, query, key_, value, mask)
    assert jnp.allclose(out_b.astype(jnp.float32), ref_b,
                        rtol=1e-1, atol=1e-1), "mismatch (bf16)"

    print("KERNEL_OK")
</pallas_src>

<mosaic_0001>
module attributes {stable_mosaic.version = 11 : i64} {
  func.func @_linear_kernel(%arg0: i32, %arg1: i32, %arg2: i32, %arg3: memref<16x128xf32, #tpu.memory_space<vmem>>, %arg4: memref<128x128xf32, #tpu.memory_space<vmem>>, %arg5: memref<1x128xf32, #tpu.memory_space<vmem>>, %arg6: memref<16x128xf32, #tpu.memory_space<vmem>>, %arg7: memref<16x128xf32, #tpu.memory_space<vmem>>) attributes {dimension_semantics = [#tpu.dimension_semantics<parallel>, #tpu.dimension_semantics<parallel>, #tpu.dimension_semantics<arbitrary>], iteration_bounds = array<i64: 1, 1, 1>, scalar_prefetch = 0 : i64, scratch_operands = 1 : i64, tpu.core_type = #tpu.core_type<tc>, window_params = [{transform_indices = @transform_0, window_bounds = array<i64: 16, 128>}, {transform_indices = @transform_1, window_bounds = array<i64: 128, 128>}, {transform_indices = @transform_2, window_bounds = array<i64: 1, 128>}, {transform_indices = @transform_3, window_bounds = array<i64: 16, 128>}]} {
    %c0_i32 = arith.constant 0 : i32
    %0 = arith.cmpi eq, %arg2, %c0_i32 : i32
    %1 = arith.extui %0 : i1 to i32
    %c0_i32_0 = arith.constant 0 : i32
    %2 = arith.cmpi ne, %1, %c0_i32_0 : i32
    scf.if %2 {
      %cst_10 = arith.constant 0.000000e+00 : f32
      %12 = vector.broadcast %cst_10 : f32 to vector<16x128xf32>
      %c0_11 = arith.constant 0 : index
      %c0_12 = arith.constant 0 : index
      %13 = vector.load %arg7[%c0_11, %c0_12] : memref<16x128xf32, #tpu.memory_space<vmem>>, vector<16x128xf32>
      tpu.vector_store %arg7[%c0_11, %c0_12], %12 {strides = array<i32>} : memref<16x128xf32, #tpu.memory_space<vmem>>, vector<16x128xf32>,
    } else {
    }
    %c0 = arith.constant 0 : index
    %c0_1 = arith.constant 0 : index
    %3 = vector.load %arg7[%c0, %c0_1] : memref<16x128xf32, #tpu.memory_space<vmem>>, vector<16x128xf32>
    %c0_2 = arith.constant 0 : index
    %c0_3 = arith.constant 0 : index
    %4 = vector.load %arg3[%c0_2, %c0_3] : memref<16x128xf32, #tpu.memory_space<vmem>>, vector<16x128xf32>
    %c0_4 = arith.constant 0 : index
    %c0_5 = arith.constant 0 : index
    %5 = vector.load %arg4[%c0_4, %c0_5] : memref<128x128xf32, #tpu.memory_space<vmem>>, vector<128x128xf32>
    %cst = arith.constant dense<0.000000e+00> : vector<16x128xf32>
    %6 = tpu.matmul %4, %5, %cst {dimension_numbers = #tpu.dot_dimension_numbers<[1], [0], [0], [1], [0, 0, 1, 1], [], []>} : vector<16x128xf32>, vector<128x128xf32>, vector<16x128xf32> -> vector<16x128xf32>
    %7 = arith.addf %3, %6 : vector<16x128xf32>
    %c0_6 = arith.constant 0 : index
    %c0_7 = arith.constant 0 : index
    %8 = vector.load %arg7[%c0_6, %c0_7] : memref<16x128xf32, #tpu.memory_space<vmem>>, vector<16x128xf32>
    tpu.vector_store %arg7[%c0_6, %c0_7], %7 {strides = array<i32>} : memref<16x128xf32, #tpu.memory_space<vmem>>, vector<16x128xf32>,
    %c0_i32_8 = arith.constant 0 : i32
    %9 = arith.cmpi eq, %arg2, %c0_i32_8 : i32
    %10 = arith.extui %9 : i1 to i32
    %c0_i32_9 = arith.constant 0 : i32
    %11 = arith.cmpi ne, %10, %c0_i32_9 : i32
    scf.if %11 {
      %c0_10 = arith.constant 0 : index
      %c0_11 = arith.constant 0 : index
      %12 = vector.load %arg7[%c0_10, %c0_11] : memref<16x128xf32, #tpu.memory_space<vmem>>, vector<16x128xf32>
      %c0_12 = arith.constant 0 : index
      %c0_13 = arith.constant 0 : index
      %13 = vector.load %arg5[%c0_12, %c0_13] : memref<1x128xf32, #tpu.memory_space<vmem>>, vector<1x128xf32>
      %14 = vector.broadcast %13 : vector<1x128xf32> to vector<16x128xf32>
      %15 = arith.addf %12, %14 : vector<16x128xf32>
      %c0_14 = arith.constant 0 : index
      %c0_15 = arith.constant 0 : index
      %16 = vector.load %arg6[%c0_14, %c0_15] : memref<16x128xf32, #tpu.memory_space<vmem>>, vector<16x128xf32>
      tpu.vector_store %arg6[%c0_14, %c0_15], %15 {strides = array<i32>} : memref<16x128xf32, #tpu.memory_space<vmem>>, vector<16x128xf32>,
    } else {
    }
    return
  }
  func.func @transform_0(%arg0: i32, %arg1: i32, %arg2: i32) -> (i32, i32) {
    %c0_i32 = arith.constant 0 : i32
    return %arg0, %arg2 : i32, i32
  }
  func.func @transform_1(%arg0: i32, %arg1: i32, %arg2: i32) -> (i32, i32) {
    %c0_i32 = arith.constant 0 : i32
    return %arg2, %arg1 : i32, i32
  }
  func.func @transform_2(%arg0: i32, %arg1: i32, %arg2: i32) -> (i32, i32) {
    %c0_i32 = arith.constant 0 : i32
    %c0_i32_0 = arith.constant 0 : i32
    return %c0_i32, %arg1 : i32, i32
  }
  func.func @transform_3(%arg0: i32, %arg1: i32, %arg2: i32) -> (i32, i32) {
    %c0_i32 = arith.constant 0 : i32
    return %arg0, %arg1 : i32, i32
  }
}

module attributes {stable_mosaic.version = 11 : i64} {
  func.func @_linear_kernel(%arg0: i32, %arg1: i32, %arg2: i32, %arg3: memref<16x128xf32, #tpu.memory_space<vmem>>, %arg4: memref<128x128xf32, #tpu.memory_space<vmem>>, %arg5: memref<1x128xf32, #tpu.memory_space<vmem>>, %arg6: memref<16x128xf32, #tpu.memory_space<vmem>>, %arg7: memref<16x128xf32, #tpu.memory_space<vmem>>) attributes {dimension_semantics = [#tpu.dimension_semantics<parallel>, #tpu.dimension_semantics<parallel>, #tpu.dimension_semantics<arbitrary>], iteration_bounds = array<i64: 1, 1, 1>, scalar_prefetch = 0 : i64, scratch_operands = 1 : i64, tpu.core_type = #tpu.core_type<tc>, window_params = [{transform_indices = @transform_0, window_bounds = array<i64: 16, 128>}, {transform_indices = @transform_1, window_bounds = array<i64: 128, 128>}, {transform_indices = @transform_2, window_bounds = array<i64: 1, 128>}, {transform_indices = @transform_3, window_bounds = array<i64: 16, 128>}]} {
    %c0_i32 = arith.constant 0 : i32
    %0 = arith.cmpi eq, %arg2, %c0_i32 : i32
    %1 = arith.extui %0 : i1 to i32
    %c0_i32_0 = arith.constant 0 : i32
    %2 = arith.cmpi ne, %1, %c0_i32_0 : i32
    scf.if %2 {
      %cst_10 = arith.constant 0.000000e+00 : f32
      %12 = vector.broadcast %cst_10 : f32 to vector<16x128xf32>
      %c0_11 = arith.constant 0 : index
      %c0_12 = arith.constant 0 : index
      %13 = vector.load %arg7[%c0_11, %c0_12] : memref<16x128xf32, #tpu.memory_space<vmem>>, vector<16x128xf32>
      tpu.vector_store %arg7[%c0_11, %c0_12], %12 {strides = array<i32>} : memref<16x128xf32, #tpu.memory_space<vmem>>, vector<16x128xf32>,
    } else {
    }
    %c0 = arith.constant 0 : index
    %c0_1 = arith.constant 0 : index
    %3 = vector.load %arg7[%c0, %c0_1] : memref<16x128xf32, #tpu.memory_space<vmem>>, vector<16x128xf32>
    %c0_2 = arith.constant 0 : index
    %c0_3 = arith.constant 0 : index
    %4 = vector.load %arg3[%c0_2, %c0_3] : memref<16x128xf32, #tpu.memory_space<vmem>>, vector<16x128xf32>
    %c0_4 = arith.constant 0 : index
    %c0_5 = arith.constant 0 : index
    %5 = vector.load %arg4[%c0_4, %c0_5] : memref<128x128xf32, #tpu.memory_space<vmem>>, vector<128x128xf32>
    %cst = arith.constant dense<0.000000e+00> : vector<16x128xf32>
    %6 = tpu.matmul %4, %5, %cst {dimension_numbers = #tpu.dot_dimension_numbers<[1], [0], [0], [1], [0, 0, 1, 1], [], []>} : vector<16x128xf32>, vector<128x128xf32>, vector<16x128xf32> -> vector<16x128xf32>
    %7 = arith.addf %3, %6 : vector<16x128xf32>
    %c0_6 = arith.constant 0 : index
    %c0_7 = arith.constant 0 : index
    %8 = vector.load %arg7[%c0_6, %c0_7] : memref<16x128xf32, #tpu.memory_space<vmem>>, vector<16x128xf32>
    tpu.vector_store %arg7[%c0_6, %c0_7], %7 {strides = array<i32>} : memref<16x128xf32, #tpu.memory_space<vmem>>, vector<16x128xf32>,
    %c0_i32_8 = arith.constant 0 : i32
    %9 = arith.cmpi eq, %arg2, %c0_i32_8 : i32
    %10 = arith.extui %9 : i1 to i32
    %c0_i32_9 = arith.constant 0 : i32
    %11 = arith.cmpi ne, %10, %c0_i32_9 : i32
    scf.if %11 {
      %c0_10 = arith.constant 0 : index
      %c0_11 = arith.constant 0 : index
      %12 = vector.load %arg7[%c0_10, %c0_11] : memref<16x128xf32, #tpu.memory_space<vmem>>, vector<16x128xf32>
      %c0_12 = arith.constant 0 : index
      %c0_13 = arith.constant 0 : index
      %13 = vector.load %arg5[%c0_12, %c0_13] : memref<1x128xf32, #tpu.memory_space<vmem>>, vector<1x128xf32>
      %14 = vector.broadcast %13 : vector<1x128xf32> to vector<16x128xf32>
      %15 = arith.addf %12, %14 : vector<16x128xf32>
      %c0_14 = arith.constant 0 : index
      %c0_15 = arith.constant 0 : index
      %16 = vector.load %arg6[%c0_14, %c0_15] : memref<16x128xf32, #tpu.memory_space<vmem>>, vector<16x128xf32>
      tpu.vector_store %arg6[%c0_14, %c0_15], %15 {strides = array<i32>} : memref<16x128xf32, #tpu.memory_space<vmem>>, vector<16x128xf32>,
    } else {
    }
    return
  }
  func.func @transform_0(%arg0: i32, %arg1: i32, %arg2: i32) -> (i32, i32) {
    %c0_i32 = arith.constant 0 : i32
    return %arg0, %arg2 : i32, i32
  }
  func.func @transform_1(%arg0: i32, %arg1: i32, %arg2: i32) -> (i32, i32) {
    %c0_i32 = arith.constant 0 : i32
    return %arg2, %arg1 : i32, i32
  }
  func.func @transform_2(%arg0: i32, %arg1: i32, %arg2: i32) -> (i32, i32) {
    %c0_i32 = arith.constant 0 : i32
    %c0_i32_0 = arith.constant 0 : i32
    return %c0_i32, %arg1 : i32, i32
  }
  func.func @transform_3(%arg0: i32, %arg1: i32, %arg2: i32) -> (i32, i32) {
    %c0_i32 = arith.constant 0 : i32
    return %arg0, %arg1 : i32, i32
  }
}

module attributes {stable_mosaic.version = 11 : i64} {
  func.func @_flash_mha_kernel(%arg0: i32, %arg1: i32, %arg2: i32, %arg3: memref<1x8x128xf32, #tpu.memory_space<vmem>>, %arg4: memref<1x8x128xf32, #tpu.memory_space<vmem>>, %arg5: memref<1x8x128xf32, #tpu.memory_space<vmem>>, %arg6: memref<1x1x8xi32, #tpu.memory_space<vmem>>, %arg7: memref<1x8x128xf32, #tpu.memory_space<vmem>>, %arg8: memref<8x4xf32, #tpu.memory_space<vmem>>, %arg9: memref<8x4xf32, #tpu.memory_space<vmem>>, %arg10: memref<8x128xf32, #tpu.memory_space<vmem>>) attributes {dimension_semantics = [#tpu.dimension_semantics<parallel>, #tpu.dimension_semantics<parallel>, #tpu.dimension_semantics<arbitrary>], iteration_bounds = array<i64: 2, 1, 1>, scalar_prefetch = 0 : i64, scratch_operands = 3 : i64, tpu.core_type = #tpu.core_type<tc>, window_params = [{transform_indices = @transform_0, window_bounds = array<i64: 1, 8, 128>}, {transform_indices = @transform_1, window_bounds = array<i64: 1, 8, 128>}, {transform_indices = @transform_2, window_bounds = array<i64: 1, 8, 128>}, {transform_indices = @transform_3, window_bounds = array<i64: 1, 1, 8>}, {transform_indices = @transform_4, window_bounds = array<i64: 1, 8, 128>}]} {
    %c0_i32 = arith.constant 0 : i32
    %0 = arith.cmpi eq, %arg2, %c0_i32 : i32
    %1 = arith.extui %0 : i1 to i32
    %c0_i32_0 = arith.constant 0 : i32
    %2 = arith.cmpi ne, %1, %c0_i32_0 : i32
    scf.if %2 {
      %cst_103 = arith.constant 0xFF800000 : f32
      %142 = vector.broadcast %cst_103 : f32 to vector<8x4xf32>
      %c0_104 = arith.constant 0 : index
      %c0_105 = arith.constant 0 : index
      %143 = vector.load %arg8[%c0_104, %c0_105] : memref<8x4xf32, #tpu.memory_space<vmem>>, vector<8x4xf32>
      tpu.vector_store %arg8[%c0_104, %c0_105], %142 {strides = array<i32>} : memref<8x4xf32, #tpu.memory_space<vmem>>, vector<8x4xf32>,
      %cst_106 = arith.constant 0.000000e+00 : f32
      %144 = vector.broadcast %cst_106 : f32 to vector<8x4xf32>
      %c0_107 = arith.constant 0 : index
      %c0_108 = arith.constant 0 : index
      %145 = vector.load %arg9[%c0_107, %c0_108] : memref<8x4xf32, #tpu.memory_space<vmem>>, vector<8x4xf32>
      tpu.vector_store %arg9[%c0_107, %c0_108], %144 {strides = array<i32>} : memref<8x4xf32, #tpu.memory_space<vmem>>, vector<8x4xf32>,
      %cst_109 = arith.constant 0.000000e+00 : f32
      %146 = vector.broadcast %cst_109 : f32 to vector<8x128xf32>
      %c0_110 = arith.constant 0 : index
      %c0_111 = arith.constant 0 : index
      %147 = vector.load %arg10[%c0_110, %c0_111] : memref<8x128xf32, #tpu.memory_space<vmem>>, vector<8x128xf32>
      tpu.vector_store %arg10[%c0_110, %c0_111], %146 {strides = array<i32>} : memref<8x128xf32, #tpu.memory_space<vmem>>, vector<8x128xf32>,
    } else {
    }
    %c0 = arith.constant 0 : index
    %c0_1 = arith.constant 0 : index
    %c0_2 = arith.constant 0 : index
    %3 = vector.load %arg6[%c0, %c0_1, %c0_2] : memref<1x1x8xi32, #tpu.memory_space<vmem>>, vector<1x1x8xi32>
    %4 = vector.shape_cast %3 : vector<1x1x8xi32> to vector<1x8xi32>
    %c0_i32_3 = arith.constant 0 : i32
    %5 = vector.broadcast %c0_i32_3 : i32 to vector<1x8xi32>
    %6 = arith.cmpi ne, %4, %5 : vector<1x8xi32>
    %c0_4 = arith.constant 0 : index
    %c0_5 = arith.constant 0 : index
    %c0_6 = arith.constant 0 : index
    %7 = vector.load %arg3[%c0_4, %c0_5, %c0_6] : memref<1x8x128xf32, #tpu.memory_space<vmem>>, vector<1x8x32xf32>
    %8 = vector.shape_cast %7 : vector<1x8x32xf32> to vector<8x32xf32>
    %c0_7 = arith.constant 0 : index
    %c0_8 = arith.constant 0 : index
    %c0_9 = arith.constant 0 : index
    %9 = vector.load %arg4[%c0_7, %c0_8, %c0_9] : memref<1x8x128xf32, #tpu.memory_space<vmem>>, vector<1x8x32xf32>
    %10 = vector.shape_cast %9 : vector<1x8x32xf32> to vector<8x32xf32>
    %c0_10 = arith.constant 0 : index
    %c0_11 = arith.constant 0 : index
    %c0_12 = arith.constant 0 : index
    %11 = vector.load %arg5[%c0_10, %c0_11, %c0_12] : memref<1x8x128xf32, #tpu.memory_space<vmem>>, vector<1x8x32xf32>
    %12 = vector.shape_cast %11 : vector<1x8x32xf32> to vector<8x32xf32>
    %cst = arith.constant dense<0.000000e+00> : vector<8x8xf32>
    %13 = tpu.matmul %8, %10, %cst {dimension_numbers = #tpu.dot_dimension_numbers<[1], [1], [0], [0], [0, 0, 1, 0], [], []>} : vector<8x32xf32>, vector<8x32xf32>, vector<8x8xf32> -> vector<8x8xf32>
    %cst_13 = arith.constant -1.000000e+09 : f32
    %14 = vector.shape_cast %6 : vector<1x8xi1> to vector<1x8xi1>
    %15 = vector.broadcast %14 : vector<1x8xi1> to vector<8x8xi1>
    %16 = vector.broadcast %cst_13 : f32 to vector<8x8xf32>
    %17 = arith.select %15, %13, %16 : vector<8x8xi1>, vector<8x8xf32>
    %c0_14 = arith.constant 0 : index
    %c0_15 = arith.constant 0 : index
    %18 = vector.load %arg8[%c0_14, %c0_15] : memref<8x4xf32, #tpu.memory_space<vmem>>, vector<8x1xf32>
    %cst_16 = arith.constant dense<0xFF800000> : vector<8xf32>
    %19 = vector.multi_reduction <maximumf>, %17, %cst_16 [1] : vector<8x8xf32> to vector<8xf32>
    %20 = vector.shape_cast %19 : vector<8xf32> to vector<8x1xf32>
    %21 = arith.maximumf %18, %20 : vector<8x1xf32>
    %22 = arith.subf %18, %21 : vector<8x1xf32>
    %23 = math.exp %22 : vector<8x1xf32>
    %24 = vector.broadcast %21 : vector<8x1xf32> to vector<8x8xf32>
    %25 = arith.subf %17, %24 : vector<8x8xf32>
    %26 = math.exp %25 : vector<8x8xf32>
    %c0_17 = arith.constant 0 : index
    %c0_18 = arith.constant 0 : index
    %27 = vector.load %arg9[%c0_17, %c0_18] : memref<8x4xf32, #tpu.memory_space<vmem>>, vector<8x1xf32>
    %28 = arith.mulf %23, %27 : vector<8x1xf32>
    %cst_19 = arith.constant dense<0.000000e+00> : vector<8xf32>
    %29 = vector.multi_reduction <add>, %26, %cst_19 [1] : vector<8x8xf32> to vector<8xf32>
    %30 = vector.shape_cast %29 : vector<8xf32> to vector<8x1xf32>
    %31 = arith.addf %28, %30 : vector<8x1xf32>
    %c0_20 = arith.constant 0 : index
    %c0_21 = arith.constant 0 : index
    %32 = vector.load %arg9[%c0_20, %c0_21] : memref<8x4xf32, #tpu.memory_space<vmem>>, vector<8x1xf32>
    tpu.vector_store %arg9[%c0_20, %c0_21], %31 {strides = array<i32>} : memref<8x4xf32, #tpu.memory_space<vmem>>, vector<8x1xf32>,
    %cst_22 = arith.constant dense<0.000000e+00> : vector<8x32xf32>
    %33 = tpu.matmul %26, %12, %cst_22 {dimension_numbers = #tpu.dot_dimension_numbers<[1], [0], [0], [1], [0, 0, 1, 1], [], []>} : vector<8x8xf32>, vector<8x32xf32>, vector<8x32xf32> -> vector<8x32xf32>
    %c0_23 = arith.constant 0 : index
    %c0_24 = arith.constant 0 : index
    %34 = vector.load %arg10[%c0_23, %c0_24] : memref<8x128xf32, #tpu.memory_space<vmem>>, vector<8x32xf32>
    %35 = vector.broadcast %23 : vector<8x1xf32> to vector<8x32xf32>
    %36 = arith.mulf %35, %34 : vector<8x32xf32>
    %37 = arith.addf %36, %33 : vector<8x32xf32>
    %c0_25 = arith.constant 0 : index
    %c0_26 = arith.constant 0 : index
    %38 = vector.load %arg10[%c0_25, %c0_26] : memref<8x128xf32, #tpu.memory_space<vmem>>, vector<8x32xf32>
    tpu.vector_store %arg10[%c0_25, %c0_26], %37 {strides = array<i32>} : memref<8x128xf32, #tpu.memory_space<vmem>>, vector<8x32xf32>,
    %c0_27 = arith.constant 0 : index
    %c0_28 = arith.constant 0 : index
    %39 = vector.load %arg8[%c0_27, %c0_28] : memref<8x4xf32, #tpu.memory_space<vmem>>, vector<8x1xf32>
    tpu.vector_store %arg8[%c0_27, %c0_28], %21 {strides = array<i32>} : memref<8x4xf32, #tpu.memory_space<vmem>>, vector<8x1xf32>,
    %c0_29 = arith.constant 0 : index
    %c0_30 = arith.constant 0 : index
    %c32 = arith.constant 32 : index
    %40 = vector.load %arg3[%c0_29, %c0_30, %c32] : memref<1x8x128xf32, #tpu.memory_space<vmem>>, vector<1x8x32xf32>
    %41 = vector.shape_cast %40 : vector<1x8x32xf32> to vector<8x32xf32>
    %c0_31 = arith.constant 0 : index
    %c0_32 = arith.constant 0 : index
    %c32_33 = arith.constant 32 : index
    %42 = vector.load %arg4[%c0_31, %c0_32, %c32_33] : memref<1x8x128xf32, #tpu.memory_space<vmem>>, vector<1x8x32xf32>
    %43 = vector.shape_cast %42 : vector<1x8x32xf32> to vector<8x32xf32>
    %c0_34 = arith.constant 0 : index
    %c0_35 = arith.constant 0 : index
    %c32_36 = arith.constant 32 : index
    %44 = vector.load %arg5[%c0_34, %c0_35, %c32_36] : memref<1x8x128xf32, #tpu.memory_space<vmem>>, vector<1x8x32xf32>
    %45 = vector.shape_cast %44 : vector<1x8x32xf32> to vector<8x32xf32>
    %cst_37 = arith.constant dense<0.000000e+00> : vector<8x8xf32>
    %46 = tpu.matmul %41, %43, %cst_37 {dimension_numbers = #tpu.dot_dimension_numbers<[1], [1], [0], [0], [0, 0, 1, 0], [], []>} : vector<8x32xf32>, vector<8x32xf32>, vector<8x8xf32> -> vector<8x8xf32>
    %cst_38 = arith.constant -1.000000e+09 : f32
    %47 = vector.shape_cast %6 : vector<1x8xi1> to vector<1x8xi1>
    %48 = vector.broadcast %47 : vector<1x8xi1> to vector<8x8xi1>
    %49 = vector.broadcast %cst_38 : f32 to vector<8x8xf32>
    %50 = arith.select %48, %46, %49 : vector<8x8xi1>, vector<8x8xf32>
    %c0_39 = arith.constant 0 : index
    %c1 = arith.constant 1 : index
    %51 = vector.load %arg8[%c0_39, %c1] : memref<8x4xf32, #tpu.memory_space<vmem>>, vector<8x1xf32>
    %cst_40 = arith.constant dense<0xFF800000> : vector<8xf32>
    %52 = vector.multi_reduction <maximumf>, %50, %cst_40 [1] : vector<8x8xf32> to vector<8xf32>
    %53 = vector.shape_cast %52 : vector<8xf32> to vector<8x1xf32>
    %54 = arith.maximumf %51, %53 : vector<8x1xf32>
    %55 = arith.subf %51, %54 : vector<8x1xf32>
    %56 = math.exp %55 : vector<8x1xf32>
    %57 = vector.broadcast %54 : vector<8x1xf32> to vector<8x8xf32>
    %58 = arith.subf %50, %57 : vector<8x8xf32>
    %59 = math.exp %58 : vector<8x8xf32>
    %c0_41 = arith.constant 0 : index
    %c1_42 = arith.constant 1 : index
    %60 = vector.load %arg9[%c0_41, %c1_42] : memref<8x4xf32, #tpu.memory_space<vmem>>, vector<8x1xf32>
    %61 = arith.mulf %56, %60 : vector<8x1xf32>
    %cst_43 = arith.constant dense<0.000000e+00> : vector<8xf32>
    %62 = vector.multi_reduction <add>, %59, %cst_43 [1] : vector<8x8xf32> to vector<8xf32>
    %63 = vector.shape_cast %62 : vector<8xf32> to vector<8x1xf32>
    %64 = arith.addf %61, %63 : vector<8x1xf32>
    %c0_44 = arith.constant 0 : index
    %c1_45 = arith.constant 1 : index
    %65 = vector.load %arg9[%c0_44, %c1_45] : memref<8x4xf32, #tpu.memory_space<vmem>>, vector<8x1xf32>
    tpu.vector_store %arg9[%c0_44, %c1_45], %64 {strides = array<i32>} : memref<8x4xf32, #tpu.memory_space<vmem>>, vector<8x1xf32>,
    %cst_46 = arith.constant dense<0.000000e+00> : vector<8x32xf32>
    %66 = tpu.matmul %59, %45, %cst_46 {dimension_numbers = #tpu.dot_dimension_numbers<[1], [0], [0], [1], [0, 0, 1, 1], [], []>} : vector<8x8xf32>, vector<8x32xf32>, vector<8x32xf32> -> vector<8x32xf32>
    %c0_47 = arith.constant 0 : index
    %c32_48 = arith.constant 32 : index
    %67 = vector.load %arg10[%c0_47, %c32_48] : memref<8x128xf32, #tpu.memory_space<vmem>>, vector<8x32xf32>
    %68 = vector.broadcast %56 : vector<8x1xf32> to vector<8x32xf32>
    %69 = arith.mulf %68, %67 : vector<8x32xf32>
    %70 = arith.addf %69, %66 : vector<8x32xf32>
    %c0_49 = arith.constant 0 : index
    %c32_50 = arith.constant 32 : index
    %71 = vector.load %arg10[%c0_49, %c32_50] : memref<8x128xf32, #tpu.memory_space<vmem>>, vector<8x32xf32>
    tpu.vector_store %arg10[%c0_49, %c32_50], %70 {strides = array<i32>} : memref<8x128xf32, #tpu.memory_space<vmem>>, vector<8x32xf32>,
    %c0_51 = arith.constant 0 : index
    %c1_52 = arith.constant 1 : index
    %72 = vector.load %arg8[%c0_51, %c1_52] : memref<8x4xf32, #tpu.memory_space<vmem>>, vector<8x1xf32>
    tpu.vector_store %arg8[%c0_51, %c1_52], %54 {strides = array<i32>} : memref<8x4xf32, #tpu.memory_space<vmem>>, vector<8x1xf32>,
    %c0_53 = arith.constant 0 : index
    %c0_54 = arith.constant 0 : index
    %c64 = arith.constant 64 : index
    %73 = vector.load %arg3[%c0_53, %c0_54, %c64] : memref<1x8x128xf32, #tpu.memory_space<vmem>>, vector<1x8x32xf32>
    %74 = vector.shape_cast %73 : vector<1x8x32xf32> to vector<8x32xf32>
    %c0_55 = arith.constant 0 : index
    %c0_56 = arith.constant 0 : index
    %c64_57 = arith.constant 64 : index
    %75 = vector.load %arg4[%c0_55, %c0_56, %c64_57] : memref<1x8x128xf32, #tpu.memory_space<vmem>>, vector<1x8x32xf32>
    %76 = vector.shape_cast %75 : vector<1x8x32xf32> to vector<8x32xf32>
    %c0_58 = arith.constant 0 : index
    %c0_59 = arith.constant 0 : index
    %c64_60 = arith.constant 64 : index
    %77 = vector.load %arg5[%c0_58, %c0_59, %c64_60] : memref<1x8x128xf32, #tpu.memory_space<vmem>>, vector<1x8x32xf32>
    %78 = vector.shape_cast %77 : vector<1x8x32xf32> to vector<8x32xf32>
    %cst_61 = arith.constant dense<0.000000e+00> : vector<8x8xf32>
    %79 = tpu.matmul %74, %76, %cst_61 {dimension_numbers = #tpu.dot_dimension_numbers<[1], [1], [0], [0], [0, 0, 1, 0], [], []>} : vector<8x32xf32>, vector<8x32xf32>, vector<8x8xf32> -> vector<8x8xf32>
    %cst_62 = arith.constant -1.000000e+09 : f32
    %80 = vector.shape_cast %6 : vector<1x8xi1> to vector<1x8xi1>
    %81 = vector.broadcast %80 : vector<1x8xi1> to vector<8x8xi1>
    %82 = vector.broadcast %cst_62 : f32 to vector<8x8xf32>
    %83 = arith.select %81, %79, %82 : vector<8x8xi1>, vector<8x8xf32>
    %c0_63 = arith.constant 0 : index
    %c2 = arith.constant 2 : index
    %84 = vector.load %arg8[%c0_63, %c2] : memref<8x4xf32, #tpu.memory_space<vmem>>, vector<8x1xf32>
    %cst_64 = arith.constant dense<0xFF800000> : vector<8xf32>
    %85 = vector.multi_reduction <maximumf>, %83, %cst_64 [1] : vector<8x8xf32> to vector<8xf32>
    %86 = vector.shape_cast %85 : vector<8xf32> to vector<8x1xf32>
    %87 = arith.maximumf %84, %86 : vector<8x1xf32>
    %88 = arith.subf %84, %87 : vector<8x1xf32>
    %89 = math.exp %88 : vector<8x1xf32>
    %90 = vector.broadcast %87 : vector<8x1xf32> to vector<8x8xf32>
    %91 = arith.subf %83, %90 : vector<8x8xf32>
    %92 = math.exp %91 : vector<8x8xf32>
    %c0_65 = arith.constant 0 : index
    %c2_66 = arith.constant 2 : index
    %93 = vector.load %arg9[%c0_65, %c2_66] : memref<8x4xf32, #tpu.memory_space<vmem>>, vector<8x1xf32>
    %94 = arith.mulf %89, %93 : vector<8x1xf32>
    %cst_67 = arith.constant dense<0.000000e+00> : vector<8xf32>
    %95 = vector.multi_reduction <add>, %92, %cst_67 [1] : vector<8x8xf32> to vector<8xf32>
    %96 = vector.shape_cast %95 : vector<8xf32> to vector<8x1xf32>
    %97 = arith.addf %94, %96 : vector<8x1xf32>
    %c0_68 = arith.constant 0 : index
    %c2_69 = arith.constant 2 : index
    %98 = vector.load %arg9[%c0_68, %c2_69] : memref<8x4xf32, #tpu.memory_space<vmem>>, vector<8x1xf32>
    tpu.vector_store %arg9[%c0_68, %c2_69], %97 {strides = array<i32>} : memref<8x4xf32, #tpu.memory_space<vmem>>, vector<8x1xf32>,
    %cst_70 = arith.constant dense<0.000000e+00> : vector<8x32xf32>
    %99 = tpu.matmul %92, %78, %cst_70 {dimension_numbers = #tpu.dot_dimension_numbers<[1], [0], [0], [1], [0, 0, 1, 1], [], []>} : vector<8x8xf32>, vector<8x32xf32>, vector<8x32xf32> -> vector<8x32xf32>
    %c0_71 = arith.constant 0 : index
    %c64_72 = arith.constant 64 : index
    %100 = vector.load %arg10[%c0_71, %c64_72] : memref<8x128xf32, #tpu.memory_space<vmem>>, vector<8x32xf32>
    %101 = vector.broadcast %89 : vector<8x1xf32> to vector<8x32xf32>
    %102 = arith.mulf %101, %100 : vector<8x32xf32>
    %103 = arith.addf %102, %99 : vector<8x32xf32>
    %c0_73 = arith.constant 0 : index
    %c64_74 = arith.constant 64 : index
    %104 = vector.load %arg10[%c0_73, %c64_74] : memref<8x128xf32, #tpu.memory_space<vmem>>, vector<8x32xf32>
    tpu.vector_store %arg10[%c0_73, %c64_74], %103 {strides = array<i32>} : memref<8x128xf32, #tpu.memory_space<vmem>>, vector<8x32xf32>,
    %c0_75 = arith.constant 0 : index
    %c2_76 = arith.constant 2 : index
    %105 = vector.load %arg8[%c0_75, %c2_76] : memref<8x4xf32, #tpu.memory_space<vmem>>, vector<8x1xf32>
    tpu.vector_store %arg8[%c0_75, %c2_76], %87 {strides = array<i32>} : memref<8x4xf32, #tpu.memory_space<vmem>>, vector<8x1xf32>,
    %c0_77 = arith.constant 0 : index
    %c0_78 = arith.constant 0 : index
    %c96 = arith.constant 96 : index
    %106 = vector.load %arg3[%c0_77, %c0_78, %c96] : memref<1x8x128xf32, #tpu.memory_space<vmem>>, vector<1x8x32xf32>
    %107 = vector.shape_cast %106 : vector<1x8x32xf32> to vector<8x32xf32>
    %c0_79 = arith.constant 0 : index
    %c0_80 = arith.constant 0 : index
    %c96_81 = arith.constant 96 : index
    %108 = vector.load %arg4[%c0_79, %c0_80, %c96_81] : memref<1x8x128xf32, #tpu.memory_space<vmem>>, vector<1x8x32xf32>
    %109 = vector.shape_cast %108 : vector<1x8x32xf32> to vector<8x32xf32>
    %c0_82 = arith.constant 0 : index
    %c0_83 = arith.constant 0 : index
    %c96_84 = arith.constant 96 : index
    %110 = vector.load %arg5[%c0_82, %c0_83, %c96_84] : memref<1x8x128xf32, #tpu.memory_space<vmem>>, vector<1x8x32xf32>
    %111 = vector.shape_cast %110 : vector<1x8x32xf32> to vector<8x32xf32>
    %cst_85 = arith.constant dense<0.000000e+00> : vector<8x8xf32>
    %112 = tpu.matmul %107, %109, %cst_85 {dimension_numbers = #tpu.dot_dimension_numbers<[1], [1], [0], [0], [0, 0, 1, 0], [], []>} : vector<8x32xf32>, vector<8x32xf32>, vector<8x8xf32> -> vector<8x8xf32>
    %cst_86 = arith.constant -1.000000e+09 : f32
    %113 = vector.shape_cast %6 : vector<1x8xi1> to vector<1x8xi1>
    %114 = vector.broadcast %113 : vector<1x8xi1> to vector<8x8xi1>
    %115 = vector.broadcast %cst_86 : f32 to vector<8x8xf32>
    %116 = arith.select %114, %112, %115 : vector<8x8xi1>, vector<8x8xf32>
    %c0_87 = arith.constant 0 : index
    %c3 = arith.constant 3 : index
    %117 = vector.load %arg8[%c0_87, %c3] : memref<8x4xf32, #tpu.memory_space<vmem>>, vector<8x1xf32>
    %cst_88 = arith.constant dense<0xFF800000> : vector<8xf32>
    %118 = vector.multi_reduction <maximumf>, %116, %cst_88 [1] : vector<8x8xf32> to vector<8xf32>
    %119 = vector.shape_cast %118 : vector<8xf32> to vector<8x1xf32>
    %120 = arith.maximumf %117, %119 : vector<8x1xf32>
    %121 = arith.subf %117, %120 : vector<8x1xf32>
    %122 = math.exp %121 : vector<8x1xf32>
    %123 = vector.broadcast %120 : vector<8x1xf32> to vector<8x8xf32>
    %124 = arith.subf %116, %123 : vector<8x8xf32>
    %125 = math.exp %124 : vector<8x8xf32>
    %c0_89 = arith.constant 0 : index
    %c3_90 = arith.constant 3 : index
    %126 = vector.load %arg9[%c0_89, %c3_90] : memref<8x4xf32, #tpu.memory_space<vmem>>, vector<8x1xf32>
    %127 = arith.mulf %122, %126 : vector<8x1xf32>
    %cst_91 = arith.constant dense<0.000000e+00> : vector<8xf32>
    %128 = vector.multi_reduction <add>, %125, %cst_91 [1] : vector<8x8xf32> to vector<8xf32>
    %129 = vector.shape_cast %128 : vector<8xf32> to vector<8x1xf32>
    %130 = arith.addf %127, %129 : vector<8x1xf32>
    %c0_92 = arith.constant 0 : index
    %c3_93 = arith.constant 3 : index
    %131 = vector.load %arg9[%c0_92, %c3_93] : memref<8x4xf32, #tpu.memory_space<vmem>>, vector<8x1xf32>
    tpu.vector_store %arg9[%c0_92, %c3_93], %130 {strides = array<i32>} : memref<8x4xf32, #tpu.memory_space<vmem>>, vector<8x1xf32>,
    %cst_94 = arith.constant dense<0.000000e+00> : vector<8x32xf32>
    %132 = tpu.matmul %125, %111, %cst_94 {dimension_numbers = #tpu.dot_dimension_numbers<[1], [0], [0], [1], [0, 0, 1, 1], [], []>} : vector<8x8xf32>, vector<8x32xf32>, vector<8x32xf32> -> vector<8x32xf32>
    %c0_95 = arith.constant 0 : index
    %c96_96 = arith.constant 96 : index
    %133 = vector.load %arg10[%c0_95, %c96_96] : memref<8x128xf32, #tpu.memory_space<vmem>>, vector<8x32xf32>
    %134 = vector.broadcast %122 : vector<8x1xf32> to vector<8x32xf32>
    %135 = arith.mulf %134, %133 : vector<8x32xf32>
    %136 = arith.addf %135, %132 : vector<8x32xf32>
    %c0_97 = arith.constant 0 : index
    %c96_98 = arith.constant 96 : index
    %137 = vector.load %arg10[%c0_97, %c96_98] : memref<8x128xf32, #tpu.memory_space<vmem>>, vector<8x32xf32>
    tpu.vector_store %arg10[%c0_97, %c96_98], %136 {strides = array<i32>} : memref<8x128xf32, #tpu.memory_space<vmem>>, vector<8x32xf32>,
    %c0_99 = arith.constant 0 : index
    %c3_100 = arith.constant 3 : index
    %138 = vector.load %arg8[%c0_99, %c3_100] : memref<8x4xf32, #tpu.memory_space<vmem>>, vector<8x1xf32>
    tpu.vector_store %arg8[%c0_99, %c3_100], %120 {strides = array<i32>} : memref<8x4xf32, #tpu.memory_space<vmem>>, vector<8x1xf32>,
    %c0_i32_101 = arith.constant 0 : i32
    %139 = arith.cmpi eq, %arg2, %c0_i32_101 : i32
    %140 = arith.extui %139 : i1 to i32
    %c0_i32_102 = arith.constant 0 : i32
    %141 = arith.cmpi ne, %140, %c0_i32_102 : i32
    scf.if %141 {
      %c0_103 = arith.constant 0 : index
      %c0_104 = arith.constant 0 : index
      %142 = vector.load %arg9[%c0_103, %c0_104] : memref<8x4xf32, #tpu.memory_space<vmem>>, vector<8x4xf32>
      %143 = tpu.reciprocal %142 {approx = true} : vector<8x4xf32> -> vector<8x4xf32>
      %144 = arith.mulf %142, %143 : vector<8x4xf32>
      %cst_105 = arith.constant 2.000000e+00 : f32
      %145 = vector.broadcast %cst_105 : f32 to vector<8x4xf32>
      %146 = arith.subf %145, %144 : vector<8x4xf32>
      %147 = arith.mulf %143, %146 : vector<8x4xf32>
      %c0_106 = arith.constant 0 : index
      %c0_107 = arith.constant 0 : index
      %148 = vector.load %arg10[%c0_106, %c0_107] : memref<8x128xf32, #tpu.memory_space<vmem>>, vector<8x32xf32>
      %149 = vector.extract_strided_slice %147 {offsets = [0, 0], sizes = [8, 1], strides = [1, 1]} : vector<8x4xf32> to vector<8x1xf32>
      %150 = vector.broadcast %149 : vector<8x1xf32> to vector<8x32xf32>
      %151 = arith.mulf %148, %150 : vector<8x32xf32>
      %c0_108 = arith.constant 0 : index
      %c32_109 = arith.constant 32 : index
      %152 = vector.load %arg10[%c0_108, %c32_109] : memref<8x128xf32, #tpu.memory_space<vmem>>, vector<8x32xf32>
      %153 = vector.extract_strided_slice %147 {offsets = [0, 1], sizes = [8, 1], strides = [1, 1]} : vector<8x4xf32> to vector<8x1xf32>
      %154 = vector.broadcast %153 : vector<8x1xf32> to vector<8x32xf32>
      %155 = arith.mulf %152, %154 : vector<8x32xf32>
      %c0_110 = arith.constant 0 : index
      %c64_111 = arith.constant 64 : index
      %156 = vector.load %arg10[%c0_110, %c64_111] : memref<8x128xf32, #tpu.memory_space<vmem>>, vector<8x32xf32>
      %157 = vector.extract_strided_slice %147 {offsets = [0, 2], sizes = [8, 1], strides = [1, 1]} : vector<8x4xf32> to vector<8x1xf32>
      %158 = vector.broadcast %157 : vector<8x1xf32> to vector<8x32xf32>
      %159 = arith.mulf %156, %158 : vector<8x32xf32>
      %c0_112 = arith.constant 0 : index
      %c96_113 = arith.constant 96 : index
      %160 = vector.load %arg10[%c0_112, %c96_113] : memref<8x128xf32, #tpu.memory_space<vmem>>, vector<8x32xf32>
      %161 = vector.extract_strided_slice %147 {offsets = [0, 3], sizes = [8, 1], strides = [1, 1]} : vector<8x4xf32> to vector<8x1xf32>
      %162 = vector.broadcast %161 : vector<8x1xf32> to vector<8x32xf32>
      %163 = arith.mulf %160, %162 : vector<8x32xf32>
      %164 = tpu.concatenate %151, %155, %159, %163 in 1 : vector<8x32xf32>, vector<8x32xf32>, vector<8x32xf32>, vector<8x32xf32> -> vector<8x128xf32>
      %c0_114 = arith.constant 0 : index
      %c0_115 = arith.constant 0 : index
      %c0_116 = arith.constant 0 : index
      %165 = vector.load %arg7[%c0_114, %c0_115, %c0_116] : memref<1x8x128xf32, #tpu.memory_space<vmem>>, vector<1x8x128xf32>
      %166 = vector.shape_cast %165 : vector<1x8x128xf32> to vector<8x128xf32>
      %167 = vector.shape_cast %164 : vector<8x128xf32> to vector<1x8x128xf32>
      tpu.vector_store %arg7[%c0_114, %c0_115, %c0_116], %167 {strides = array<i32>} : memref<1x8x128xf32, #tpu.memory_space<vmem>>, vector<1x8x128xf32>,
    } else {
    }
    return
  }
  func.func @transform_0(%arg0: i32, %arg1: i32, %arg2: i32) -> (i32, i32, i32) {
    %c0_i32 = arith.constant 0 : i32
    %c0_i32_0 = arith.constant 0 : i32
    return %arg0, %arg1, %c0_i32 : i32, i32, i32
  }
  func.func @transform_1(%arg0: i32, %arg1: i32, %arg2: i32) -> (i32, i32, i32) {
    %c0_i32 = arith.constant 0 : i32
    %c0_i32_0 = arith.constant 0 : i32
    return %arg0, %arg2, %c0_i32 : i32, i32, i32
  }
  func.func @transform_2(%arg0: i32, %arg1: i32, %arg2: i32) -> (i32, i32, i32) {
    %c0_i32 = arith.constant 0 : i32
    %c0_i32_0 = arith.constant 0 : i32
    return %arg0, %arg2, %c0_i32 : i32, i32, i32
  }
  func.func @transform_3(%arg0: i32, %arg1: i32, %arg2: i32) -> (i32, i32, i32) {
    %c0_i32 = arith.constant 0 : i32
    %c0_i32_0 = arith.constant 0 : i32
    return %arg0, %c0_i32, %arg2 : i32, i32, i32
  }
  func.func @transform_4(%arg0: i32, %arg1: i32, %arg2: i32) -> (i32, i32, i32) {
    %c0_i32 = arith.constant 0 : i32
    %c0_i32_0 = arith.constant 0 : i32
    return %arg0, %arg1, %c0_i32 : i32, i32, i32
  }
}

</mosaic_0001>

<bundles_post_ra>
// kernel: _lambda_.5
= control target key start
LH: loop header
LB: loop body
LE: loop exit
PB: predicated region body
PF: predicated region fallthrough
CT: control target
= control target key end

     0   :  { %8 = vsyncpa [#allocation4], 0  ;;  %s230_s0 = inlined_call_operand.hbm [shape: f32[16,128], index: 0, kind: input, shape index: {}]   ;;  %s231_s1 = inlined_call_operand.hbm [shape: f32[128,128], index: 1, kind: input, shape index: {}]   ;;  %s232_s2 = inlined_call_operand.vmem [shape: f32[1,128], index: 2, kind: input, shape index: {}]   ;;  %s233_s3 = inlined_call_operand.vmem [shape: f32[16,128], index: 3, kind: output, shape index: {}]  }
   0x1   :  { %s14_s14 = sshll.u32 %s230_s0, 4  ;;  %s15_s14 = int_to_ptr.hbm [resolvable:$true] %s14_s14 }
   0x2   :  { %9 = vsyncpa [#allocation6], 0  ;;  %s191_s15 = smov [#allocation3]   ;;  %s27_s19 = sshll.u32 %s231_s1, 4  ;;  %s28_s19 = int_to_ptr.hbm [resolvable:$true] %s27_s19 }
   0x3   :  { %s16_s16 = sshll.u32 %s191_s15, 4  ;;  %s192_s20 = smov 128   ;;  %s17_s16 = int_to_ptr.vmem [resolvable:$true] %s16_s16 }
   0x4   :  { %s193_s21 = smov 8   ;;  %s194_s22 = smov [#allocation5]  }
   0x5   :  { %22 = dma.hbm_to_vmem [thread:$0]  %s15_s14, 256, %s17_s16, [#allocation4], %s192_s20, %s192_s20, %s193_s21  }
   0x6   :  { %s29_s23 = sshll.u32 %s194_s22, 4  ;;  %s30_s23 = int_to_ptr.vmem [resolvable:$true] %s29_s23 }
   0x7   :  { %35 = dma.hbm_to_vmem [thread:$0]  %s28_s19, 2048, %s30_s23, [#allocation6], %s192_s20, %s192_s20, %s193_s21  }
   0x8   :  { %187 = dma.done.wait [#allocation4], 256  }
   0x9   :  { %188 = vsyncadd [#allocation4], 4294967040 }
   0xa   :  { %189 = dma.done.wait [#allocation6], 2048  }
   0xb   :  { %190 = vsyncadd [#allocation6], 4294965248  ;;  %v71_v0 = vld [vmem:[#allocation5 + $0x78] sm:$0xff]  ;;  %v70_v1 = vld [vmem:[#allocation5 + $0x70] sm:$0xff] }
   0xc   :  { %72 = vmatpush.msra.mxu0 %v71_v0  ;;  %118 = vmatpush.msra.mxu1 %v71_v0  ;;  %v69_v2 = vld [vmem:[#allocation5 + $0x68] sm:$0xff]  ;;  %v68_v3 = vld [vmem:[#allocation5 + $0x60] sm:$0xff]  ;;  %v67_v4 = vld [vmem:[#allocation5 + $0x58] sm:$0xff] }
   0xd   :  { %v66_v5 = vld [vmem:[#allocation5 + $0x50] sm:$0xff]  ;;  %v65_v6 = vld [vmem:[#allocation5 + $0x48] sm:$0xff]  ;;  %v64_v7 = vld [vmem:[#allocation5 + $0x40] sm:$0xff] }
   0xe   :  { %73 = vmatpush.msra.mxu0 %v70_v1  ;;  %119 = vmatpush.msra.mxu1 %v70_v1  ;;  %v63_v8 = vld [vmem:[#allocation5 + $0x38] sm:$0xff]  ;;  %v62_v9 = vld [vmem:[#allocation5 + $0x30] sm:$0xff]  ;;  %v61_v10 = vld [vmem:[#allocation5 + $0x28] sm:$0xff] }
   0xf   :  { %v60_v11 = vld [vmem:[#allocation5 + $0x20] sm:$0xff]  ;;  %v59_v12 = vld [vmem:[#allocation5 + $0x18] sm:$0xff]  ;;  %v58_v13 = vld [vmem:[#allocation5 + $0x10] sm:$0xff] }
  0x10   :  { %74 = vmatpush.msra.mxu0 %v69_v2  ;;  %120 = vmatpush.msra.mxu1 %v69_v2  ;;  %v57_v14 = vld [vmem:[#allocation5 + $0x8] sm:$0xff]  ;;  %v56_v15 = vld [vmem:[#allocation5] sm:$0xff]  ;;  %v54_v16 = vld [vmem:[#allocation3] sm:$0xff] }
  0x11   :  { %v55_v17 = vld [vmem:[#allocation3 + $0x8] sm:$0xff]  ;;  %v138_v18 = vld [vmem:[%s232_s2] ss:$0 sm:$0xff] }
  0x12   :  { %75 = vmatpush.msra.mxu0 %v68_v3  ;;  %121 = vmatpush.msra.mxu1 %v68_v3 }
  0x14   :  { %76 = vmatpush.msra.mxu0 %v67_v4  ;;  %122 = vmatpush.msra.mxu1 %v67_v4 }
  0x16   :  { %77 = vmatpush.msra.mxu0 %v66_v5  ;;  %123 = vmatpush.msra.mxu1 %v66_v5 }
  0x18   :  { %78 = vmatpush.msra.mxu0 %v65_v6  ;;  %124 = vmatpush.msra.mxu1 %v65_v6 }
  0x1a   :  { %79 = vmatpush.msra.mxu0 %v64_v7  ;;  %125 = vmatpush.msra.mxu1 %v64_v7 }
  0x1c   :  { %80 = vmatpush.msra.mxu0 %v63_v8  ;;  %126 = vmatpush.msra.mxu1 %v63_v8 }
  0x1e   :  { %81 = vmatpush.msra.mxu0 %v62_v9  ;;  %127 = vmatpush.msra.mxu1 %v62_v9 }
  0x20   :  { %82 = vmatpush.msra.mxu0 %v61_v10  ;;  %128 = vmatpush.msra.mxu1 %v61_v10 }
  0x22   :  { %83 = vmatpush.msra.mxu0 %v60_v11  ;;  %129 = vmatpush.msra.mxu1 %v60_v11 }
  0x24   :  { %84 = vmatpush.msra.mxu0 %v59_v12  ;;  %130 = vmatpush.msra.mxu1 %v59_v12 }
  0x26   :  { %85 = vmatpush.msra.mxu0 %v58_v13  ;;  %131 = vmatpush.msra.mxu1 %v58_v13 }
  0x28   :  { %86 = vmatpush.msra.mxu0 %v57_v14  ;;  %132 = vmatpush.msra.mxu1 %v57_v14 }
  0x2a   :  { %87 = vmatpush.msra.mxu0 %v56_v15  ;;  %133 = vmatpush.msra.mxu1 %v56_v15 }
  0x2b   :  { %88 = vmatmul.f32.vlgmr.msra.gmra.mxu0 %v54_v16  ;;  %91 = vmatmul.f32.vlgmr.msra.gmra.mxu1 %v55_v17 }
  0xa8   :  { %v89_v19 = vpop.f32.mrf.mxu0  ;;  %v92_v20 = vpop.f32.mrf.mxu1 }
  0xa9   :  { %v108_v21 = vadd.f32 %v138_v18, %v89_v19  ;;  %v109_v22 = vadd.f32 %v138_v18, %v92_v20 }
  0xab   :  { %110 = vst [vmem:[%s233_s3] sm:$0xff] %v108_v21 }
  0xac   :  { %111 = vst [vmem:[%s233_s3 + $0x8] sm:$0xff] %v109_v22 }
  0xad   :  { %116 = vsyncpa [#allocation4], 1 }
  0xae   :  { %117 = vsyncpa [#allocation6], 1 }

// kernel: _lambda_.9
= control target key start
LH: loop header
LB: loop body
LE: loop exit
PB: predicated region body
PF: predicated region fallthrough
CT: control target
= control target key end

     0   :  { %8 = vsyncpa [#allocation4], 0  ;;  %s234_s0 = inlined_call_operand.vmem [shape: f32[16,128], index: 0, kind: input, shape index: {}]   ;;  %s235_s1 = inlined_call_operand.hbm [shape: f32[128,128], index: 1, kind: input, shape index: {}]   ;;  %s236_s2 = inlined_call_operand.vmem [shape: f32[1,128], index: 2, kind: input, shape index: {}]   ;;  %s237_s3 = inlined_call_operand.hbm [shape: f32[16,128], index: 3, kind: output, shape index: {}]  }
   0x1   :  { %9 = vsyncpa [#allocation5], 0  ;;  %s16_s14 = sshll.u32 %s235_s1, 4  ;;  %s189_s15 = smov [#allocation3]   ;;  %s17_s14 = int_to_ptr.hbm [resolvable:$true] %s16_s14 }
   0x2   :  { %s18_s16 = sshll.u32 %s189_s15, 4  ;;  %s190_s17 = smov 128   ;;  %s19_s16 = int_to_ptr.vmem [resolvable:$true] %s18_s16 }
   0x3   :  { %s191_s18 = smov 8  }
   0x4   :  { %24 = dma.hbm_to_vmem [thread:$0]  %s17_s14, 2048, %s19_s16, [#allocation4], %s190_s17, %s190_s17, %s191_s18  }
   0x5   :  { %185 = dma.done.wait [#allocation4], 2048  }
   0x6   :  { %186 = vsyncadd [#allocation4], 4294965248  ;;  %v56_v0 = vld [vmem:[#allocation3 + $0x78] sm:$0xff]  ;;  %v55_v1 = vld [vmem:[#allocation3 + $0x70] sm:$0xff]  ;;  %s192_s24 = smov [#allocation6]   ;;  %s103_s28 = sshll.u32 %s237_s3, 4  ;;  %s104_s28 = int_to_ptr.hbm [resolvable:$true] %s103_s28 }
   0x7   :  { %57 = vmatpush.msra.mxu0 %v56_v0  ;;  %116 = vmatpush.msra.mxu1 %v56_v0  ;;  %v54_v2 = vld [vmem:[#allocation3 + $0x68] sm:$0xff]  ;;  %v53_v3 = vld [vmem:[#allocation3 + $0x60] sm:$0xff]  ;;  %v52_v4 = vld [vmem:[#allocation3 + $0x58] sm:$0xff]  ;;  %s101_s25 = sshll.u32 %s192_s24, 4  ;;  %s102_s25 = int_to_ptr.vmem [resolvable:$true] %s101_s25 }
   0x8   :  { %v51_v5 = vld [vmem:[#allocation3 + $0x50] sm:$0xff]  ;;  %v50_v6 = vld [vmem:[#allocation3 + $0x48] sm:$0xff]  ;;  %v49_v7 = vld [vmem:[#allocation3 + $0x40] sm:$0xff] }
   0x9   :  { %58 = vmatpush.msra.mxu0 %v55_v1  ;;  %117 = vmatpush.msra.mxu1 %v55_v1  ;;  %v48_v8 = vld [vmem:[#allocation3 + $0x38] sm:$0xff]  ;;  %v47_v9 = vld [vmem:[#allocation3 + $0x30] sm:$0xff]  ;;  %v46_v10 = vld [vmem:[#allocation3 + $0x28] sm:$0xff] }
   0xa   :  { %v45_v11 = vld [vmem:[#allocation3 + $0x20] sm:$0xff]  ;;  %v44_v12 = vld [vmem:[#allocation3 + $0x18] sm:$0xff]  ;;  %v43_v13 = vld [vmem:[#allocation3 + $0x10] sm:$0xff] }
   0xb   :  { %59 = vmatpush.msra.mxu0 %v54_v2  ;;  %118 = vmatpush.msra.mxu1 %v54_v2  ;;  %v42_v14 = vld [vmem:[#allocation3 + $0x8] sm:$0xff]  ;;  %v41_v15 = vld [vmem:[#allocation3] sm:$0xff] }
   0xc   :  { %v39_v16 = vld [vmem:[%s234_s0] sm:$0xff]  ;;  %v40_v17 = vld [vmem:[%s234_s0 + $0x8] sm:$0xff] }
   0xd   :  { %60 = vmatpush.msra.mxu0 %v53_v3  ;;  %119 = vmatpush.msra.mxu1 %v53_v3  ;;  %v136_v18 = vld [vmem:[%s236_s2] ss:$0 sm:$0xff] }
   0xf   :  { %61 = vmatpush.msra.mxu0 %v52_v4  ;;  %120 = vmatpush.msra.mxu1 %v52_v4 }
  0x11   :  { %62 = vmatpush.msra.mxu0 %v51_v5  ;;  %121 = vmatpush.msra.mxu1 %v51_v5 }
  0x13   :  { %63 = vmatpush.msra.mxu0 %v50_v6  ;;  %122 = vmatpush.msra.mxu1 %v50_v6 }
  0x15   :  { %64 = vmatpush.msra.mxu0 %v49_v7  ;;  %123 = vmatpush.msra.mxu1 %v49_v7 }
  0x17   :  { %65 = vmatpush.msra.mxu0 %v48_v8  ;;  %124 = vmatpush.msra.mxu1 %v48_v8 }
  0x19   :  { %66 = vmatpush.msra.mxu0 %v47_v9  ;;  %125 = vmatpush.msra.mxu1 %v47_v9 }
  0x1b   :  { %67 = vmatpush.msra.mxu0 %v46_v10  ;;  %126 = vmatpush.msra.mxu1 %v46_v10 }
  0x1d   :  { %68 = vmatpush.msra.mxu0 %v45_v11  ;;  %127 = vmatpush.msra.mxu1 %v45_v11 }
  0x1f   :  { %69 = vmatpush.msra.mxu0 %v44_v12  ;;  %128 = vmatpush.msra.mxu1 %v44_v12 }
  0x21   :  { %70 = vmatpush.msra.mxu0 %v43_v13  ;;  %129 = vmatpush.msra.mxu1 %v43_v13 }
  0x23   :  { %71 = vmatpush.msra.mxu0 %v42_v14  ;;  %130 = vmatpush.msra.mxu1 %v42_v14 }
  0x25   :  { %72 = vmatpush.msra.mxu0 %v41_v15  ;;  %131 = vmatpush.msra.mxu1 %v41_v15 }
  0x26   :  { %73 = vmatmul.f32.vlgmr.msra.gmra.mxu0 %v39_v16  ;;  %76 = vmatmul.f32.vlgmr.msra.gmra.mxu1 %v40_v17 }
  0xa3   :  { %v74_v19 = vpop.f32.mrf.mxu0  ;;  %v77_v20 = vpop.f32.mrf.mxu1 }
  0xa4   :  { %v93_v21 = vadd.f32 %v136_v18, %v74_v19  ;;  %v94_v22 = vadd.f32 %v136_v18, %v77_v20 }
  0xa6   :  { %95 = vst [vmem:[#allocation6] sm:$0xff] %v93_v21 }
  0xa7   :  { %96 = vst [vmem:[#allocation6 + $0x8] sm:$0xff] %v94_v22 }
  0xa8   :  { %109 = dma.vmem_to_hbm [thread:$0]  %s102_s25, 256, %s104_s28, [#allocation5], %s190_s17, %s190_s17, %s191_s18  }
  0xa9   :  { %187 = dma.done.wait [#allocation5], 256  }
  0xaa   :  { %188 = vsyncadd [#allocation5], 4294967040 }
  0xab   :  { %114 = vsyncpa [#allocation4], 1 }
  0xac   :  { %115 = vsyncpa [#allocation5], 1 }

// kernel: _lambda_.8
= control target key start
LH: loop header
LB: loop body
LE: loop exit
PB: predicated region body
PF: predicated region fallthrough
CT: control target
= control target key end

     0   :  { %s1012_s15 = smov 0   ;;  %s1014_s16 = smov 0   ;;  %s1141_s0 = inlined_call_operand.vmem [shape: f32[2,8,128], index: 0, kind: input, shape index: {}]   ;;  %s1142_s1 = inlined_call_operand.vmem [shape: f32[2,8,128], index: 1, kind: input, shape index: {}]   ;;  %s1143_s2 = inlined_call_operand.vmem [shape: f32[2,8,128], index: 2, kind: input, shape index: {}]   ;;  %s1144_s3 = inlined_call_operand.vmem [shape: s32[2,1,8], index: 3, kind: input, shape index: {}]   ;;  %s1145_s4 = inlined_call_operand.vmem [shape: f32[2,8,128], index: 4, kind: output, shape index: {}]  }
   0x1   :  { %s1016_s17 = smov 0  }
   0x2 LB: > { %s33_s18 = sadd.s32 1, %s972_s16  ;;  %p873_p0 = scmp.ge.s32.totalorder %s976_s17, 1  ;;  %s976_s17 = sphi %s1016_s17, %s14_s17   ;;  %s972_s16 = sphi %s1014_s16, %s1149_s16   ;;  %s968_s15 = sphi %s1012_s15, %s1148_s15  }
   0x3   : > { %p35_p1 = scmp.ge.s32.totalorder %s33_s18, 2  ;;  %p228_p2 = scmp.lt.s32.totalorder %s976_s17, 3 }
   0x5   : > { %s1151_s18 = smov (%p35_p1, %s33_s18), 0  ;;  %p229_p3 = pnand %p873_p0, %p228_p2 }
   0x6   : > { %p278_p4 = scmp.lt.s32.totalorder (!%p229_p3), %s968_s15, 1  ;;  %s980_s29 = smov (!%p229_p3), 64  }
   0x7   : > { %232 = sbr.rel (%p229_p3) target bundleno = 1057 (0x421), region = 36  ;;  %s981_s30 = smov (!%p229_p3), 96  }
   0x8   : > { %s982_s5 = smov (!%p229_p3), 32  }
   0xc   : > { %s1153_s15 = smov (!%p278_p4, %s968_s15), 1  ;;  %vm325_vm0 = vcmask 261120   ;;  %v978_v2 = vmov 0   ;;  %vm316_vm1 = vcmask 31744   ;;  %v979_v3 = vmov -inf  }
   0xd   : > { %s1030_s19 = sshll.u32 %s1153_s15, 3  ;;  %925 = vset.pattern.permute.xlu1 %v978_v2  ;;  %317 = vst.msk [vmem:[#allocation2] sm:$0xff] %vm316_vm1, %v979_v3  ;;  %s304_s28 = scalar_lea.vmem %s1144_s3, %s1153_s15  ;;  %vm357_vm4 = vcmask 64512   ;;  %v983_v11 = vmov 0.0   ;;  %vm379_vm5 = vcmask 7168   ;;  %v984_v37 = vmov 1  }
   0xe   : > { %s291_s22 = scalar_lea.vmem %s1142_s1, %s1030_s19  ;;  %s284_s25 = scalar_lea.vmem %s1141_s0, %s1030_s19  ;;  %v320_v4 = vld [vmem:[%s304_s28] sm:$0x1]  ;;  %319 = vst [vmem:[#allocation4] sm:$0xff] %v983_v11  ;;  %926 = vset.pattern.permute.xlu2 %v984_v37  ;;  %v985_v38 = vmov 2   ;;  %v986_v39 = vmov 3   ;;  %vm470_vm6 = vcmask 15368  }
   0xf   : > { %v323_v0 = vld [vmem:[%s291_s22] sm:$0xff]  ;;  %vm321_vm2 = vcmp.ne.s32.totalorder %v320_v4, 0  ;;  %318 = vst.msk [vmem:[#allocation3] sm:$0xff] %vm316_vm1, %v983_v11  ;;  %s298_s8 = scalar_lea.vmem %s1143_s2, %s1030_s19  ;;  %927 = vset.pattern.permute.xlu0 %v985_v38  ;;  %vm570_vm7 = vcmask 23568   ;;  %vm670_vm8 = vcmask 31768   ;;  %vm511_vm9 = vcmask 523520   ;;  %s311_s11 = scalar_lea.vmem %s1145_s4, %s1030_s19 }
  0x10   : > { %878 = vmatpush.xpose.msk.msra.mxu0 %vm325_vm0, %v323_v0  ;;  %v322_v1 = vld [vmem:[%s284_s25] sm:$0xff]  ;;  %v352_v5 = vsel %vm321_vm2, 1, %v978_v2  ;;  %521 = vrot.lane.b32.xlu2 %v323_v0, %s980_s29  ;;  %vm611_vm10 = vcmask 785920   ;;  %vm711_vm11 = vcmask 1048320   ;;  %vm745_vm12 = vcmask 523264  }
  0x11   : > { %v353_v6 = vperm.slane %v352_v5, 0  ;;  %v324_v17 = vld [vmem:[%s298_s8] sm:$0xff]  ;;  %vm747_vm13 = vcmask 785408  }
  0x12   : > { %399 = vmatpush.msra.mxu1 %v324_v17 }
  0x13   : > { %879 = vmatmul.msk.f32.vlgmr.msra.gmra.mxu0 %vm325_vm0, %v322_v1  ;;  %vm1048_vm3 = vcmp.eq.s32.totalorder %v353_v6, 1 }
  0x14   : > { %v1060_v12 = vld [vmem:[#allocation2] sm:$0xff] }
  0x18   : > { %518 = vrot.lane.b32.xlu2 %v322_v1, %s980_s29 }
  0x20   : > { %618 = vrot.lane.b32.xlu2 %v322_v1, %s982_s5 }
  0x6a   : > { %v522_v18 = vpop.permute.xlu2 %521 }
  0x6b   : > { %884 = vmatpush.xpose.msk.msrb.mxu1 %vm325_vm0, %v522_v18  ;;  %v373_v18 = vld [vmem:[#allocation3] sm:$0xff] }
  0x72   : > { %v519_v23 = vpop.permute.xlu2 %518 }
  0x7a   : > { %v619_v26 = vpop.permute.xlu2 %618 }
  0x90   : > { %v349_v8 = vpop.f32.mrf.mxu0 }
  0x91   : > { %v355_v9 = vsel %vm1048_vm3, %v349_v8, -1e+09 }
  0x92   : > { %v358_v10 = vsel %vm357_vm4, %v355_v9, -inf }
  0x93   : > { %359 = vmax.xlane.f32.xlu0 %v358_v10 }
  0xa7   : > { %421 = vrot.lane.b32.xlu0 %v323_v0, %s981_s30 }
 0x106   : > { %v360_v13 = vpop.xlane.xlu0 %359 }
 0x107   : > { %v361_v14 = vmax.f32 %v1060_v12, %v360_v13 }
 0x109   : > { %v362_v15 = vsub.f32 %v1060_v12, %v361_v14  ;;  %413 = vst.msk [vmem:[#allocation2] sm:$0xff] %vm379_vm5, %v361_v14  ;;  %367 = vperm.xlu1 %925, %v361_v14  }
 0x10b   : > { %v363_v47 = vmul.f32 1.442695, %v362_v15 }
 0x110   : > { %v448_v40 = vld [vmem:[#allocation2] sm:$0xff] }
 0x111   : > { %418 = vrot.lane.b32.xlu1 %v322_v1, %s981_s30 }
 0x112   : > { %928 = vset.pattern.permute.xlu1 %v986_v39 }
 0x119   : > { %621 = vrot.lane.b32.xlu1 %v323_v0, %s982_s5  ;;  %v422_v16 = vpop.permute.xlu0 %421 }
 0x11a   : > { %881 = vmatpush.xpose.msk.msra.mxu2 %vm325_vm0, %v422_v16 }
 0x17b   : > { %v368_v19 = vpop.permute.xlu1 %367 }
 0x17c   : > { %v370_v20 = vsub.f32 %v355_v9, %v368_v19 }
 0x17e   : > { %v371_v21 = vmul.f32 1.442695, %v370_v20 }
 0x180   : > { %936 = vpow2.f32 %v371_v21 }
 0x181   : > { %938 = vpow2.f32 %v363_v47 }
 0x183   : > { %v419_v22 = vpop.permute.xlu1 %418 }
 0x184   : > { %882 = vmatmul.msk.f32.vlgmr.msra.gmra.mxu2 %vm325_vm0, %v419_v22 }
 0x186   : > { %v937_v24 = vpop.eup %936 }
 0x187   : > { %880 = vmatmul.msk.f32.vlgmr.msra.gmra.mxu1 %vm357_vm4, %v937_v24  ;;  %v939_v54 = vpop.eup %938  ;;  %v375_v56 = vsel %vm357_vm4, %v937_v24, 0.0 }
 0x188   : > { %v374_v19 = vmul.f32 %v939_v54, %v373_v18 }
 0x18b   : > { %v622_v25 = vpop.permute.xlu1 %621 }
 0x18c   : > { %887 = vmatpush.xpose.msk.msrb.mxu0 %vm325_vm0, %v622_v25 }
 0x18f   : > { %885 = vmatmul.msk.f32.vlgmr.msrb.gmra.mxu1 %vm325_vm0, %v519_v23  ;;  %888 = vmatmul.msk.f32.vlgmr.msrb.gmra.mxu0 %vm325_vm0, %v619_v26 }
 0x204   : > { %v1078_v27 = vpop.f32.mrf.mxu1 }
 0x207   : > { %v444_v28 = vpop.f32.mrf.mxu2 }
 0x208   : > { %v447_v29 = vsel %vm1048_vm3, %v444_v28, -1e+09 }
 0x209   : > { %v449_v30 = vsel %vm357_vm4, %v447_v29, -inf }
 0x20a   : > { %450 = vmax.xlane.f32.xlu1 %v449_v30 }
 0x20c   : > { %v544_v31 = vpop.f32.mrf.mxu1  ;;  %v644_v32 = vpop.f32.mrf.mxu0 }
 0x20d   : > { %v1085_v33 = vsel %vm1048_vm3, %v544_v31, -1e+09  ;;  %v1089_v34 = vsel %vm1048_vm3, %v644_v32, -1e+09 }
 0x20e   : > { %v549_v35 = vsel %vm357_vm4, %v1085_v33, -inf  ;;  %v649_v36 = vsel %vm357_vm4, %v1089_v34, -inf }
 0x20f   : > { %550 = vmax.xlane.f32.xlu2 %v549_v35  ;;  %650 = vmax.xlane.f32.xlu0 %v649_v36 }
 0x223   : > { %473 = vrot.lane.b32.xlu1 %v324_v17, %s981_s30 }
 0x27d   : > { %v451_v41 = vpop.xlane.xlu1 %450 }
 0x27e   : > { %v452_v42 = vmax.f32 %v448_v40, %v451_v41 }
 0x280   : > { %513 = vst.msk [vmem:[#allocation2] sm:$0xff] %vm470_vm6, %v452_v42  ;;  %458 = vperm.xlu2 %926, %v452_v42   ;;  %v453_v50 = vsub.f32 %v448_v40, %v452_v42 }
 0x282   : > { %v551_v43 = vpop.xlane.xlu2 %550  ;;  %v651_v48 = vpop.xlane.xlu0 %650  ;;  %v454_v53 = vmul.f32 1.442695, %v453_v50 }
 0x284   : > { %940 = vpow2.f32 %v454_v53 }
 0x287   : > { %v548_v44 = vld [vmem:[#allocation2] sm:$0xff] }
 0x288   : > { %v552_v45 = vmax.f32 %v548_v44, %v551_v43  ;;  %573 = vrot.lane.b32.xlu2 %v324_v17, %s980_s29 }
 0x289   : > { %929 = vset.pattern.permute.xlu2 %v978_v2 }
 0x28a   : > { %v553_v46 = vsub.f32 %v548_v44, %v552_v45  ;;  %613 = vst.msk [vmem:[#allocation2] sm:$0xff] %vm570_vm7, %v552_v45  ;;  %558 = vperm.xlu0 %927, %v552_v45   ;;  %v941_v55 = vpop.eup %940 }
 0x28c   : > { %v554_v1 = vmul.f32 1.442695, %v553_v46 }
 0x290   : > { %673 = vrot.lane.b32.xlu2 %v324_v17, %s982_s5 }
 0x291   : > { %v648_v49 = vld [vmem:[#allocation2] sm:$0xff] }
 0x292   : > { %v652_v51 = vmax.f32 %v648_v49, %v651_v48 }
 0x294   : > { %v653_v52 = vsub.f32 %v648_v49, %v652_v51  ;;  %713 = vst.msk [vmem:[#allocation2] sm:$0xff] %vm670_vm8, %v652_v51  ;;  %658 = vperm.xlu1 %928, %v652_v51  }
 0x295   : > { %v474_v57 = vpop.permute.xlu1 %473 }
 0x296   : > { %494 = vmatpush.msra.mxu3 %v474_v57  ;;  %v654_v5 = vmul.f32 1.442695, %v653_v52 }
 0x298   : > { %407 = vperm.xlu2 %929, %v939_v54  }
 0x29c   : > { %932 = vset.pattern.permute.xlu1 %v978_v2 }
 0x2a0   : > { %930 = vset.pattern.permute.xlu2 %v984_v37 }
 0x2a1   : > { %502 = vperm.xlu2 %930, %v941_v55  }
 0x2be   : > { %376 = vadd.xlane.f32.xlu1 %v375_v56 }
 0x2da   : > { %v459_v58 = vpop.permute.xlu2 %458 }
 0x2db   : > { %v461_v59 = vsub.f32 %v447_v29, %v459_v58 }
 0x2dd   : > { %v462_v60 = vmul.f32 1.442695, %v461_v59 }
 0x2df   : > { %942 = vpow2.f32 %v462_v60 }
 0x2e0   : > { %944 = vpow2.f32 %v554_v1 }
 0x2e1   : > { %946 = vpow2.f32 %v654_v5 }
 0x2e2   : > { %v574_v61 = vpop.permute.xlu2 %573 }
 0x2e3   : > { %594 = vmatpush.msrb.mxu3 %v574_v61 }
 0x2e5   : > { %v943_v62 = vpop.eup %942 }
 0x2e6   : > { %883 = vmatmul.msk.f32.vlgmr.msra.gmra.mxu3 %vm357_vm4, %v943_v62  ;;  %v466_v63 = vsel %vm357_vm4, %v943_v62, 0.0  ;;  %v945_v6 = vpop.eup %944 }
 0x2e7   : > { %467 = vadd.xlane.f32.xlu0 %v466_v63  ;;  %v947_v10 = vpop.eup %946 }
 0x2ea   : > { %v674_v0 = vpop.permute.xlu2 %673 }
 0x2eb   : > { %694 = vmatpush.msrb.mxu2 %v674_v0 }
 0x2f2   : > { %v408_v2 = vpop.permute.xlu2 %407 }
 0x2f3   : > { %v410_v3 = vmul.f32 0.0, %v408_v2 }
 0x2f5   : > { %v411_v4 = vadd.f32 %v410_v3, %v1078_v27 }
 0x2f7   : > { %412 = vst.msk [vmem:[#allocation4] sm:$0xff] %vm325_vm0, %v411_v4 }
 0x2fb   : > { %602 = vperm.xlu0 %927, %v945_v6   ;;  %v503_v27 = vpop.permute.xlu2 %502 }
 0x2fc   : > { %v559_v7 = vpop.permute.xlu0 %558 }
 0x2fd   : > { %v561_v8 = vsub.f32 %v1085_v33, %v559_v7 }
 0x2fe   : > { %v499_v44 = vld [vmem:[#allocation4] sm:$0xff] }
 0x2ff   : > { %v562_v9 = vmul.f32 1.442695, %v561_v8  ;;  %v505_v45 = vmul.f32 %v503_v27, %v499_v44 }
 0x301   : > { %948 = vpow2.f32 %v562_v9 }
 0x303   : > { %931 = vset.pattern.permute.xlu0 %v986_v39 }
 0x304   : > { %702 = vperm.xlu0 %931, %v947_v10  }
 0x306   : > { %v659_v11 = vpop.permute.xlu1 %658 }
 0x307   : > { %v949_v12 = vpop.eup %948  ;;  %v661_v13 = vsub.f32 %v1089_v34, %v659_v11 }
 0x308   : > { %886 = vmatmul.msk.f32.vlgmr.msrb.gmra.mxu3 %vm357_vm4, %v949_v12  ;;  %v566_v14 = vsel %vm357_vm4, %v949_v12, 0.0 }
 0x309   : > { %v662_v15 = vmul.f32 1.442695, %v661_v13  ;;  %567 = vadd.xlane.f32.xlu2 %v566_v14 }
 0x30b   : > { %950 = vpow2.f32 %v662_v15 }
 0x30c   : > { %933 = vset.pattern.permute.xlu0 %v985_v38 }
 0x311   : > { %v951_v16 = vpop.eup %950 }
 0x312   : > { %889 = vmatmul.msk.f32.vlgmr.msrb.gmra.mxu2 %vm357_vm4, %v951_v16  ;;  %v666_v17 = vsel %vm357_vm4, %v951_v16, 0.0 }
 0x313   : > { %667 = vadd.xlane.f32.xlu1 %v666_v17 }
 0x331   : > { %v377_v20 = vpop.xlane.xlu1 %376 }
 0x332   : > { %v378_v21 = vadd.f32 %v377_v20, %v374_v19 }
 0x334   : > { %380 = vst.msk [vmem:[#allocation3] sm:$0xff] %vm379_vm5, %v378_v21 }
 0x33b   : > { %v464_v22 = vld [vmem:[#allocation3] sm:$0xff] }
 0x33c   : > { %v465_v23 = vmul.f32 %v941_v55, %v464_v22 }
 0x35a   : > { %v468_v24 = vpop.xlane.xlu0 %467 }
 0x35b   : > { %v469_v25 = vadd.f32 %v468_v24, %v465_v23 }
 0x35d   : > { %471 = vst.msk [vmem:[#allocation3] sm:$0xff] %vm470_vm6, %v469_v25 }
 0x364   : > { %v564_v28 = vld [vmem:[#allocation3] sm:$0xff] }
 0x365   : > { %v565_v29 = vmul.f32 %v945_v6, %v564_v28 }
 0x369   : > { %v496_v26 = vpop.f32.mrf.mxu3 }
 0x36a   : > { %507 = vrot.lane.b32.xlu1 %v496_v26, %s982_s5 }
 0x36d   : > { %v603_v48 = vpop.permute.xlu0 %602 }
 0x376   : > { %v703_v54 = vpop.permute.xlu0 %702 }
 0x37c   : > { %v568_v30 = vpop.xlane.xlu2 %567 }
 0x37d   : > { %v569_v31 = vadd.f32 %v568_v30, %v565_v29 }
 0x37f   : > { %571 = vst.msk [vmem:[#allocation3] sm:$0xff] %vm570_vm7, %v569_v31 }
 0x386   : > { %v664_v32 = vld [vmem:[#allocation3] sm:$0xff]  ;;  %v668_v34 = vpop.xlane.xlu1 %667 }
 0x387   : > { %v665_v33 = vmul.f32 %v947_v10, %v664_v32 }
 0x389   : > { %v669_v35 = vadd.f32 %v668_v34, %v665_v33 }
 0x38b   : > { %671 = vst.msk [vmem:[#allocation3] sm:$0xff] %vm670_vm8, %v669_v35  ;;  %v596_v36 = vpop.f32.mrf.mxu3 }
 0x38c   : > { %607 = vrot.lane.b32.xlu2 %v596_v36, %s980_s29 }
 0x392   : > { %v717_v37 = vld [vmem:[#allocation3] sm:$0xff] }
 0x393   : > { %952 = vrcp.f32 %v717_v37 }
 0x395   : > { %v696_v38 = vpop.f32.mrf.mxu2 }
 0x396   : > { %707 = vrot.lane.b32.xlu1 %v696_v38, %s981_s30 }
 0x399   : > { %v953_v40 = vpop.eup %952 }
 0x39a   : > { %v719_v41 = vmul.f32 %v953_v40, %v717_v37 }
 0x39c   : > { %v720_v42 = vsub.f32 2.0, %v719_v41 }
 0x39e   : > { %v721_v43 = vmul.f32 %v953_v40, %v720_v42 }
 0x3a0   : > { %735 = vperm.xlu0 %933, %v721_v43   ;;  %730 = vperm.xlu2 %930, %v721_v43  }
 0x3a1   : > { %725 = vperm.xlu1 %932, %v721_v43  }
 0x3a8   : > { %935 = vset.pattern.permute.xlu0 %v986_v39 }
 0x3a9   : > { %934 = vset.pattern.permute.xlu1 %v986_v39 }
 0x3aa   : > { %740 = vperm.xlu1 %934, %v721_v43  }
 0x3dc   : > { %v508_v46 = vpop.permute.xlu1 %507 }
 0x3dd   : > { %v510_v47 = vadd.f32 %v508_v46, %v505_v45 }
 0x3df   : > { %512 = vst.msk [vmem:[#allocation4] sm:$0xff] %vm511_vm9, %v510_v47 }
 0x3e6   : > { %v599_v49 = vld [vmem:[#allocation4] sm:$0xff]  ;;  %v608_v51 = vpop.permute.xlu2 %607 }
 0x3e7   : > { %v605_v50 = vmul.f32 %v603_v48, %v599_v49 }
 0x3e9   : > { %v610_v52 = vadd.f32 %v608_v51, %v605_v50 }
 0x3eb   : > { %612 = vst.msk [vmem:[#allocation4] sm:$0xff] %vm611_vm10, %v610_v52 }
 0x3f2   : > { %v699_v53 = vld [vmem:[#allocation4] sm:$0xff] }
 0x3f3   : > { %v705_v55 = vmul.f32 %v703_v54, %v699_v53 }
 0x3fa   : > { %v731_v59 = vpop.permute.xlu2 %730 }
 0x408   : > { %v708_v39 = vpop.permute.xlu1 %707 }
 0x409   : > { %v710_v56 = vadd.f32 %v708_v39, %v705_v55 }
 0x40b   : > { %712 = vst.msk [vmem:[#allocation4] sm:$0xff] %vm711_vm11, %v710_v56 }
 0x412   : > { %v722_v58 = vld [vmem:[#allocation4] sm:$0xff]  ;;  %v736_v62 = vpop.permute.xlu0 %735 }
 0x413   : > { %v726_v57 = vpop.permute.xlu1 %725  ;;  %v733_v61 = vmul.f32 %v731_v59, %v722_v58  ;;  %v738_v63 = vmul.f32 %v736_v62, %v722_v58 }
 0x414   : > { %v728_v60 = vmul.f32 %v726_v57, %v722_v58 }
 0x416   : > { %v744_v0 = vsel %vm325_vm0, %v728_v60, %v733_v61 }
 0x417   : > { %v746_v3 = vsel %vm745_vm12, %v744_v0, %v738_v63 }
 0x41c   : > { %v741_v1 = vpop.permute.xlu1 %740 }
 0x41d   : > { %v743_v2 = vmul.f32 %v741_v1, %v722_v58 }
 0x41f   : > { %v748_v4 = vsel %vm747_vm13, %v746_v3, %v743_v2 }
 0x420   : > { %749 = vst [vmem:[%s311_s11] sm:$0xff] %v748_v4 }
 0x421 PF: > { %s14_s17 = sadd.s32 1, %s976_s17   ;;  %s1148_s15 = smov %s972_s16 }
 0x422   : > { %p11_p5 = scmp.ge.s32.totalorder %s14_s17, 4   ;;  %s1149_s16 = smov %s1151_s18 }
 0x424   :  { %13 = sbr.rel (!%p11_p5) target bundleno = 2 (0x2), region = 83 }

</bundles_post_ra>
